<compile_context>
chip_gen: v5e
topology: v5e:2x2
jax: 0.10.0
libtpu: 0.0.40
codegen_flags: <defaults>
</compile_context>

<pallas_src>
import functools

import numpy as np
import jax
import jax.numpy as jnp
from jax.experimental import pallas as pl
from jax.experimental.pallas import tpu as pltpu

# ----------------------------- module configuration -----------------------------
BETA = 100.0
INV_SQRT2 = float(1.0 / np.sqrt(2.0))

D_IN = 3
NUM_PARTS = 2
D_COND = 4
D_COND_IN = NUM_PARTS * (9 + 3)          # 24  (d_in == 3 branch)
D_COND_HID = 4 * D_COND                  # 16
HIDDEN = 32
D_IN_TOTAL = D_IN + D_COND               # 7   (dims[0] after adding d_cond)
OUT1 = HIDDEN - D_IN_TOTAL               # 25  (lin1 out shrinks because layer 2 is skip)
INP8 = 8                                 # x (3) + cond-features (4) padded to 8 rows
FEAT_ROWS = INP8 + D_COND_IN             # 32  (wrapper-side feature-major input rows)

# ------------------------- packed weight-slab layout (f32) ----------------------
# One (SLAB_ROWS, 33) slab: transposed weights in cols [0:in_dim), bias in col 32.
# All row offsets are multiples of 8 so in-kernel sublane slices stay aligned.
ROW_WC0 = 0                   # (16, 24) cond lin0                        + bc0
ROW_WC1 = ROW_WC0 + 16        # (16, 16) cond lin1                        + bc1
ROW_WC2 = ROW_WC1 + 16        # ( 8, 16) cond lin2, rows 3:7 real         + bc2 (rows 3:7)
ROW_WXC = ROW_WC2 + 8         # (64,  8) fused [lin0 ; lin2/sqrt2] of inp8 + b0 (rows 0:32)
ROW_W1 = ROW_WXC + 64         # (25, 32) lin1 (pad -> 32)                 + b1
ROW_W2H = ROW_W1 + 32         # (32, 25) lin2 h-part, pre-scaled 1/sqrt2  + b2
ROW_W3 = ROW_W2H + 32         # ( 1, 32) lin3 (pad -> 8)                  + b3
SLAB_ROWS = ROW_W3 + 8        # 176
BIAS_COL = 32
SLAB_COLS = 33


def _round_up(a, b):
    return ((a + b - 1) // b) * b


def _cdiv(a, b):
    return -(-a // b)


def _softplus(v, dtype=jnp.float32):
    # torch.nn.Softplus(beta=100, threshold=20): x where beta*x > 20,
    # else log1p(exp(beta*x)) / beta.  (No clamp: the where discards the inf branch.)
    v = v.astype(dtype)
    bv = BETA * v
    return jnp.where(bv > 20.0, v, jnp.log1p(jnp.exp(bv)) * (1.0 / BETA))


def _default_act_dtype():
    """bf16 softplus/activations on chips with bf16 VPU/EUP (v6e, v7x); f32 otherwise."""
    try:
        kind = jax.devices()[0].device_kind.lower()
    except Exception:  # pragma: no cover - defensive default
        return jnp.float32
    if ("v6" in kind) or ("v7" in kind) or ("7x" in kind):
        return jnp.bfloat16
    return jnp.float32


# ----------------------------------- kernel -------------------------------------
def inr_kernel(feat_ref, w_ref, o_ref, *, act_dtype):
    bf16 = jnp.bfloat16

    def w(row, n_out, n_in):                 # weight slice -> (n_out, n_in) bf16
        return w_ref[row:row + n_out, 0:n_in].astype(bf16)

    def b(row, n_out):                       # bias slice -> (n_out, 1) f32
        return w_ref[row:row + n_out, BIAS_COL:BIAS_COL + 1]

    def mm(a, v):                            # bf16 MXU matmul, f32 accumulation
        return jnp.dot(a, v, preferred_element_type=jnp.float32)

    def sp(v):                               # Softplus(beta=100) in act_dtype
        v = v.astype(act_dtype)
        bv = BETA * v
        return jnp.where(bv > 20.0, v, jnp.log1p(jnp.exp(bv)) * (1.0 / BETA))

    xpad = feat_ref[0:INP8, :]                                   # (8, T) f32, rows 3:8 == 0
    c = feat_ref[INP8:INP8 + D_COND_IN, :].astype(bf16)          # (24, T)

    # ---- cond_projector: Linear -> Softplus -> Linear -> Softplus -> Linear ----
    z = sp(mm(w(ROW_WC0, D_COND_HID, D_COND_IN), c) + b(ROW_WC0, D_COND_HID))
    z = sp(mm(w(ROW_WC1, D_COND_HID, D_COND_HID), z.astype(bf16)) + b(ROW_WC1, D_COND_HID))
    # last cond layer writes its 4 features into rows 3:7 of an 8-row block (rest zero)
    cf8 = mm(w(ROW_WC2, INP8, D_COND_HID), z.astype(bf16)) + b(ROW_WC2, INP8)   # (8, T)

    # ---- inp = cat([x, cond]) realized as an 8-row add (no in-kernel concat) ----
    inp8 = (xpad + cf8).astype(bf16)                             # (8, T)

    # ---- fused contributions of inp8 to lin0 (rows 0:32) and lin2 (rows 32:64) ----
    # lin2 rows already carry the 1/sqrt(2) skip scaling (folded at pack time).
    xcc = mm(w(ROW_WXC, 2 * HIDDEN, INP8), inp8)                 # (64, T) f32

    # ---- lin0( cat([x, cond]) ) ----
    h = sp(xcc[:HIDDEN] + b(ROW_WXC, HIDDEN))                    # (32, T)

    # ---- lin1 ----
    h = sp(mm(w(ROW_W1, OUT1, HIDDEN), h.astype(bf16)) + b(ROW_W1, OUT1))       # (25, T)

    # ---- lin2( cat([h, x, cond]) / sqrt(2) ): scale folded into weights, bias after ----
    pre = mm(w(ROW_W2H, HIDDEN, OUT1), h.astype(bf16)) + xcc[HIDDEN:]
    h = sp(pre + b(ROW_W2H, HIDDEN))                             # (32, T)

    # ---- lin3 (no activation) ----
    out = mm(w(ROW_W3, 1, HIDDEN), h.astype(bf16)) + b(ROW_W3, 1)               # (1, T)
    o_ref[...] = out.astype(o_ref.dtype)


# ---------------------------------- wrapper --------------------------------------
def inr_forward(x, cond, weight_slab, tile_n=8192, act_dtype=None):
    """x: (N, d_in) f32, cond: (N, d_cond_in) f32 -> (N, 1) f32.

    tile_n = points per grid step.  Default 8192 amortizes the ~0.35 us per-grid-step
    overhead; capped at 16384 (v7x: 64 MiB physical / 32 MiB scoped VMEM) and we set
    vmem_limit_bytes=32 MiB explicitly so the working set also fits the v5e default.
    The step count is chosen first so padding waste stays small for mid-sized N.
    """
    N = x.shape[0]
    if act_dtype is None:
        act_dtype = _default_act_dtype()

    tile_n = int(min(max(tile_n, 128), 16384))
    npad0 = _round_up(max(N, 1), 128)
    steps = _cdiv(npad0, _round_up(tile_n, 128))
    tile = _round_up(_cdiv(npad0, steps), 128)
    npad = steps * tile

    # Single layout pass: one feature-major (32, npad) slab
    #   rows 0:3  = x^T, rows 3:8 = 0 (landing pad for the cond features),
    #   rows 8:32 = cond^T.
    feat = jnp.concatenate(
        [x, jnp.zeros((N, INP8 - D_IN), x.dtype), cond], axis=-1).astype(jnp.float32)
    if npad != N:
        feat = jnp.pad(feat, ((0, npad - N), (0, 0)))
    feat = feat.T                                                # (32, npad), lane-dense

    kernel = functools.partial(inr_kernel, act_dtype=act_dtype)
    out = pl.pallas_call(
        kernel,
        out_shape=jax.ShapeDtypeStruct((1, npad), jnp.float32),
        grid_spec=pltpu.PrefetchScalarGridSpec(
            num_scalar_prefetch=0,
            grid=(steps,),
            in_specs=[
                pl.BlockSpec((FEAT_ROWS, tile), lambda i: (0, i)),
                pl.BlockSpec(weight_slab.shape, lambda i: (0, 0)),   # single weight DMA
            ],
            out_specs=pl.BlockSpec((1, tile), lambda i: (0, i)),     # lane-dense store
        ),
        compiler_params=pltpu.CompilerParams(
            dimension_semantics=("parallel",),
            vmem_limit_bytes=32 * 1024 * 1024),
    )(feat, weight_slab)
    return out[0, :N].reshape(N, 1)


# ----------------------------- parameter construction -----------------------------
def init_params(key, d_in=D_IN, hidden=HIDDEN, num_parts=NUM_PARTS, d_cond=D_COND,
                radius_init=1.0):
    # dims = [d_in, 32, 32, 32, 1]; dims[0] += d_cond -> 7
    dims = [d_in + d_cond, hidden, hidden, hidden, 1]
    d_cond_in = num_parts * (9 + 3)     # d_in == 3 branch
    ks = jax.random.split(key, 8)
    P = {}
    # cond_projector (weights stored as (in, out), i.e. PyTorch weight.T)
    P["wc0"] = jax.random.normal(ks[0], (d_cond_in, d_cond * 4), jnp.float32) / np.sqrt(d_cond_in)
    P["bc0"] = jnp.zeros((1, d_cond * 4), jnp.float32)
    P["wc1"] = jax.random.normal(ks[1], (d_cond * 4, d_cond * 4), jnp.float32) / np.sqrt(d_cond * 4)
    P["bc1"] = jnp.zeros((1, d_cond * 4), jnp.float32)
    P["wc2"] = 1e-5 * jax.random.normal(ks[2], (d_cond * 4, d_cond), jnp.float32)  # last: N(0,1e-5)
    P["bc2"] = jnp.zeros((1, d_cond), jnp.float32)

    # lin0: in=7, out=32 ; geometric init N(0, sqrt(2)/sqrt(out))
    w0 = jax.random.normal(ks[3], (dims[0], dims[1]), jnp.float32) * (np.sqrt(2.0) / np.sqrt(dims[1]))
    P["w0x"], P["w0c"] = w0[:d_in], w0[d_in:]
    P["b0"] = jnp.zeros((1, dims[1]), jnp.float32)

    # lin1: in=32, out = dims[2] - dims[0] = 25  (layer 2 is a skip layer)
    out1 = dims[2] - dims[0]
    P["w1"] = jax.random.normal(ks[4], (dims[1], out1), jnp.float32) * (np.sqrt(2.0) / np.sqrt(out1))
    P["b1"] = jnp.zeros((1, out1), jnp.float32)

    # lin2: in = 25 + 7 = 32 (after skip concat), out = 32
    w2 = jax.random.normal(ks[5], (dims[2], dims[3]), jnp.float32) * (np.sqrt(2.0) / np.sqrt(dims[3]))
    P["w2h"], P["w2x"], P["w2c"] = w2[:out1], w2[out1:out1 + d_in], w2[out1 + d_in:]
    P["b2"] = jnp.zeros((1, dims[3]), jnp.float32)

    # lin3 (last): weight ~ N(sqrt(pi)/sqrt(dims[3]), 1e-5), bias = -radius_init
    P["w3"] = (np.sqrt(np.pi) / np.sqrt(dims[3])
               + 1e-5 * jax.random.normal(ks[6], (dims[3], 1), jnp.float32))
    P["b3"] = jnp.full((1, 1), -radius_init, jnp.float32)
    return P


def pack_params(P):
    """Pack all (transposed) weights + biases into one f32 slab (1 DMA, fetched once).

    * cond lin2 weights/bias land in rows 3:7 of an 8-row block so that the kernel can
      build inp8 = [x; cond_features; 0] with a plain 8-row add (no concat).
    * The lin2 contributions (ROW_WXC rows 32:64 and ROW_W2H) are pre-scaled by
      1/sqrt(2); the skip-layer bias is NOT scaled (matches the original module).
    """
    slab = np.zeros((SLAB_ROWS, SLAB_COLS), np.float32)

    def put_w(row, w_t, col0=0):
        w_t = np.asarray(w_t, np.float32)
        slab[row:row + w_t.shape[0], col0:col0 + w_t.shape[1]] = w_t

    def put_b(row, bias):
        bias = np.asarray(bias, np.float32).reshape(-1)
        slab[row:row + bias.size, BIAS_COL] = bias

    s = INV_SQRT2
    put_w(ROW_WC0, np.asarray(P["wc0"]).T); put_b(ROW_WC0, P["bc0"])
    put_w(ROW_WC1, np.asarray(P["wc1"]).T); put_b(ROW_WC1, P["bc1"])
    put_w(ROW_WC2 + D_IN, np.asarray(P["wc2"]).T)          # cond features -> rows 3:7
    put_b(ROW_WC2 + D_IN, P["bc2"])
    # fused lin0 / lin2 contributions of inp8 = [x(0:3); cond(3:7); 0]
    put_w(ROW_WXC, np.asarray(P["w0x"]).T, col0=0)
    put_w(ROW_WXC, np.asarray(P["w0c"]).T, col0=D_IN)
    put_w(ROW_WXC + HIDDEN, s * np.asarray(P["w2x"]).T, col0=0)
    put_w(ROW_WXC + HIDDEN, s * np.asarray(P["w2c"]).T, col0=D_IN)
    put_b(ROW_WXC, P["b0"])
    put_w(ROW_W1, np.asarray(P["w1"]).T); put_b(ROW_W1, P["b1"])
    put_w(ROW_W2H, s * np.asarray(P["w2h"]).T); put_b(ROW_W2H, P["b2"])
    put_w(ROW_W3, np.asarray(P["w3"]).T); put_b(ROW_W3, P["b3"])
    return jnp.asarray(slab)


# ----------------------------------- references -----------------------------------
def inr_ref_f32(x, cond, P):
    """Pure-JAX f32 reference mirroring the PyTorch forward exactly (explicit concats)."""
    c = _softplus(cond @ P["wc0"] + P["bc0"])
    c = _softplus(c @ P["wc1"] + P["bc1"])
    c = c @ P["wc2"] + P["bc2"]
    inp = jnp.concatenate([x, c], axis=-1)
    w0 = jnp.concatenate([P["w0x"], P["w0c"]], axis=0)
    h = _softplus(inp @ w0 + P["b0"])
    h = _softplus(h @ P["w1"] + P["b1"])
    hs = jnp.concatenate([h, inp], axis=-1) / np.sqrt(2.0)
    w2 = jnp.concatenate([P["w2h"], P["w2x"], P["w2c"]], axis=0)
    h = _softplus(hs @ w2 + P["b2"])
    return h @ P["w3"] + P["b3"]


def inr_ref_kernel_math(x, cond, slab, act_dtype):
    """Same math as the kernel (same packed weights, bf16 MXU operands, fused inp8 /
    lin0+lin2 matmul, 1/sqrt2 folded into weights, act_dtype softplus), written in
    plain row-major JAX — used for the tight numerical check."""
    bf = jnp.bfloat16
    W = slab

    def w(row, n_out, n_in):
        return W[row:row + n_out, :n_in].T.astype(bf)    # (n_in, n_out)

    def b(row, n):
        return W[row:row + n, BIAS_COL]

    def mm(a, wm):
        return jnp.dot(a.astype(bf), wm, preferred_element_type=jnp.float32)

    def sp(v):
        return _softplus(v, act_dtype)

    c = sp(mm(cond, w(ROW_WC0, D_COND_HID, D_COND_IN)) + b(ROW_WC0, D_COND_HID))
    c = sp(mm(c, w(ROW_WC1, D_COND_HID, D_COND_HID)) + b(ROW_WC1, D_COND_HID))
    cf8 = mm(c, w(ROW_WC2, INP8, D_COND_HID)) + b(ROW_WC2, INP8)        # (N, 8)
    inp8 = (jnp.pad(x, ((0, 0), (0, INP8 - D_IN))) + cf8).astype(bf)
    xcc = mm(inp8, w(ROW_WXC, 2 * HIDDEN, INP8))                        # (N, 64)
    h = sp(xcc[:, :HIDDEN] + b(ROW_WXC, HIDDEN))
    h = sp(mm(h, w(ROW_W1, OUT1, HIDDEN)) + b(ROW_W1, OUT1))
    pre = mm(h, w(ROW_W2H, HIDDEN, OUT1)) + xcc[:, HIDDEN:]
    h = sp(pre + b(ROW_W2H, HIDDEN))
    return mm(h, w(ROW_W3, 1, HIDDEN)) + b(ROW_W3, 1)


# ------------------------------------- main ---------------------------------------
if __name__ == "__main__":
    key = jax.random.PRNGKey(0)
    k_x, k_c, k_p = jax.random.split(key, 3)

    N = 256
    x = jax.random.normal(k_x, (N, D_IN), jnp.float32)
    cond = jax.random.normal(k_c, (N, D_COND_IN), jnp.float32)
    params = init_params(k_p)
    weight_slab = pack_params(params)

    act_dtype = _default_act_dtype()
    out = jax.block_until_ready(inr_forward(x, cond, weight_slab, act_dtype=act_dtype))
    assert out.shape == (N, 1)

    o = np.asarray(out)
    ref_mirror = np.asarray(inr_ref_kernel_math(x, cond, weight_slab, act_dtype))
    ref_f32 = np.asarray(inr_ref_f32(x, cond, params))

    # Tight-ish check vs. a reference using the kernel's exact packed weights, bf16 MXU
    # operands and softplus dtype (tolerance covers bf16 transcendental impl. spread).
    assert np.allclose(o, ref_mirror, rtol=2e-2, atol=2e-2), \
        f"kernel-mirror max abs diff {np.max(np.abs(o - ref_mirror))}"
    # Sanity check vs. the exact f32 PyTorch-semantics reference (bf16 rounding only).
    assert np.allclose(o, ref_f32, rtol=8e-2, atol=8e-2), \
        f"f32-reference max abs diff {np.max(np.abs(o - ref_f32))}"
    print("KERNEL_OK")
</pallas_src>

<mosaic_0001>
module attributes {stable_mosaic.version = 11 : i64} {
  func.func @inr_kernel(%arg0: i32, %arg1: memref<32x256xf32, #tpu.memory_space<vmem>>, %arg2: memref<176x33xf32, #tpu.memory_space<vmem>>, %arg3: memref<1x256xf32, #tpu.memory_space<vmem>>) attributes {dimension_semantics = [#tpu.dimension_semantics<parallel>], iteration_bounds = array<i64: 1>, scalar_prefetch = 0 : i64, scratch_operands = 0 : i64, tpu.core_type = #tpu.core_type<tc>, window_params = [{transform_indices = @transform_0, window_bounds = array<i64: 32, 256>}, {pipeline_mode = #tpu.pipeline_mode<synchronous>, transform_indices = @transform_1, window_bounds = array<i64: 176, 33>}, {transform_indices = @transform_2, window_bounds = array<i64: 1, 256>}]} {
    %c0 = arith.constant 0 : index
    %c0_0 = arith.constant 0 : index
    %0 = vector.load %arg1[%c0, %c0_0] : memref<32x256xf32, #tpu.memory_space<vmem>>, vector<8x256xf32>
    %c8 = arith.constant 8 : index
    %c0_1 = arith.constant 0 : index
    %1 = vector.load %arg1[%c8, %c0_1] : memref<32x256xf32, #tpu.memory_space<vmem>>, vector<24x256xf32>
    %2 = arith.truncf %1 : vector<24x256xf32> to vector<24x256xbf16>
    %c0_2 = arith.constant 0 : index
    %c0_3 = arith.constant 0 : index
    %3 = vector.load %arg2[%c0_2, %c0_3] : memref<176x33xf32, #tpu.memory_space<vmem>>, vector<16x24xf32>
    %4 = arith.truncf %3 : vector<16x24xf32> to vector<16x24xbf16>
    %cst = arith.constant dense<0.000000e+00> : vector<16x256xf32>
    %5 = tpu.matmul %4, %2, %cst {dimension_numbers = #tpu.dot_dimension_numbers<[1], [0], [0], [1], [0, 0, 1, 1], [], []>} : vector<16x24xbf16>, vector<24x256xbf16>, vector<16x256xf32> -> vector<16x256xf32>
    %c0_4 = arith.constant 0 : index
    %c32 = arith.constant 32 : index
    %6 = vector.load %arg2[%c0_4, %c32] : memref<176x33xf32, #tpu.memory_space<vmem>>, vector<16x1xf32>
    %7 = vector.broadcast %6 : vector<16x1xf32> to vector<16x256xf32>
    %8 = arith.addf %5, %7 : vector<16x256xf32>
    %cst_5 = arith.constant 1.000000e+02 : f32
    %9 = vector.broadcast %cst_5 : f32 to vector<16x256xf32>
    %10 = arith.mulf %9, %8 : vector<16x256xf32>
    %cst_6 = arith.constant 2.000000e+01 : f32
    %11 = vector.broadcast %cst_6 : f32 to vector<16x256xf32>
    %12 = arith.cmpf ogt, %10, %11 : vector<16x256xf32>
    %13 = math.exp %10 : vector<16x256xf32>
    %14 = math.log1p %13 : vector<16x256xf32>
    %cst_7 = arith.constant 0.00999999977 : f32
    %15 = vector.broadcast %cst_7 : f32 to vector<16x256xf32>
    %16 = arith.mulf %14, %15 : vector<16x256xf32>
    %17 = arith.select %12, %8, %16 : vector<16x256xi1>, vector<16x256xf32>
    %c16 = arith.constant 16 : index
    %c0_8 = arith.constant 0 : index
    %18 = vector.load %arg2[%c16, %c0_8] : memref<176x33xf32, #tpu.memory_space<vmem>>, vector<16x16xf32>
    %19 = arith.truncf %18 : vector<16x16xf32> to vector<16x16xbf16>
    %20 = arith.truncf %17 : vector<16x256xf32> to vector<16x256xbf16>
    %cst_9 = arith.constant dense<0.000000e+00> : vector<16x256xf32>
    %21 = tpu.matmul %19, %20, %cst_9 {dimension_numbers = #tpu.dot_dimension_numbers<[1], [0], [0], [1], [0, 0, 1, 1], [], []>} : vector<16x16xbf16>, vector<16x256xbf16>, vector<16x256xf32> -> vector<16x256xf32>
    %c16_10 = arith.constant 16 : index
    %c32_11 = arith.constant 32 : index
    %22 = vector.load %arg2[%c16_10, %c32_11] : memref<176x33xf32, #tpu.memory_space<vmem>>, vector<16x1xf32>
    %23 = vector.broadcast %22 : vector<16x1xf32> to vector<16x256xf32>
    %24 = arith.addf %21, %23 : vector<16x256xf32>
    %cst_12 = arith.constant 1.000000e+02 : f32
    %25 = vector.broadcast %cst_12 : f32 to vector<16x256xf32>
    %26 = arith.mulf %25, %24 : vector<16x256xf32>
    %cst_13 = arith.constant 2.000000e+01 : f32
    %27 = vector.broadcast %cst_13 : f32 to vector<16x256xf32>
    %28 = arith.cmpf ogt, %26, %27 : vector<16x256xf32>
    %29 = math.exp %26 : vector<16x256xf32>
    %30 = math.log1p %29 : vector<16x256xf32>
    %cst_14 = arith.constant 0.00999999977 : f32
    %31 = vector.broadcast %cst_14 : f32 to vector<16x256xf32>
    %32 = arith.mulf %30, %31 : vector<16x256xf32>
    %33 = arith.select %28, %24, %32 : vector<16x256xi1>, vector<16x256xf32>
    %c32_15 = arith.constant 32 : index
    %c0_16 = arith.constant 0 : index
    %34 = vector.load %arg2[%c32_15, %c0_16] : memref<176x33xf32, #tpu.memory_space<vmem>>, vector<8x16xf32>
    %35 = arith.truncf %34 : vector<8x16xf32> to vector<8x16xbf16>
    %36 = arith.truncf %33 : vector<16x256xf32> to vector<16x256xbf16>
    %cst_17 = arith.constant dense<0.000000e+00> : vector<8x256xf32>
    %37 = tpu.matmul %35, %36, %cst_17 {dimension_numbers = #tpu.dot_dimension_numbers<[1], [0], [0], [1], [0, 0, 1, 1], [], []>} : vector<8x16xbf16>, vector<16x256xbf16>, vector<8x256xf32> -> vector<8x256xf32>
    %c32_18 = arith.constant 32 : index
    %c32_19 = arith.constant 32 : index
    %38 = vector.load %arg2[%c32_18, %c32_19] : memref<176x33xf32, #tpu.memory_space<vmem>>, vector<8x1xf32>
    %39 = vector.broadcast %38 : vector<8x1xf32> to vector<8x256xf32>
    %40 = arith.addf %37, %39 : vector<8x256xf32>
    %41 = arith.addf %0, %40 : vector<8x256xf32>
    %42 = arith.truncf %41 : vector<8x256xf32> to vector<8x256xbf16>
    %c40 = arith.constant 40 : index
    %c0_20 = arith.constant 0 : index
    %43 = vector.load %arg2[%c40, %c0_20] : memref<176x33xf32, #tpu.memory_space<vmem>>, vector<64x8xf32>
    %44 = arith.truncf %43 : vector<64x8xf32> to vector<64x8xbf16>
    %cst_21 = arith.constant dense<0.000000e+00> : vector<64x256xf32>
    %45 = tpu.matmul %44, %42, %cst_21 {dimension_numbers = #tpu.dot_dimension_numbers<[1], [0], [0], [1], [0, 0, 1, 1], [], []>} : vector<64x8xbf16>, vector<8x256xbf16>, vector<64x256xf32> -> vector<64x256xf32>
    %46 = vector.extract_strided_slice %45 {offsets = [0, 0], sizes = [32, 256], strides = [1, 1]} : vector<64x256xf32> to vector<32x256xf32>
    %c40_22 = arith.constant 40 : index
    %c32_23 = arith.constant 32 : index
    %47 = vector.load %arg2[%c40_22, %c32_23] : memref<176x33xf32, #tpu.memory_space<vmem>>, vector<32x1xf32>
    %48 = vector.broadcast %47 : vector<32x1xf32> to vector<32x256xf32>
    %49 = arith.addf %46, %48 : vector<32x256xf32>
    %cst_24 = arith.constant 1.000000e+02 : f32
    %50 = vector.broadcast %cst_24 : f32 to vector<32x256xf32>
    %51 = arith.mulf %50, %49 : vector<32x256xf32>
    %cst_25 = arith.constant 2.000000e+01 : f32
    %52 = vector.broadcast %cst_25 : f32 to vector<32x256xf32>
    %53 = arith.cmpf ogt, %51, %52 : vector<32x256xf32>
    %54 = math.exp %51 : vector<32x256xf32>
    %55 = math.log1p %54 : vector<32x256xf32>
    %cst_26 = arith.constant 0.00999999977 : f32
    %56 = vector.broadcast %cst_26 : f32 to vector<32x256xf32>
    %57 = arith.mulf %55, %56 : vector<32x256xf32>
    %58 = arith.select %53, %49, %57 : vector<32x256xi1>, vector<32x256xf32>
    %c104 = arith.constant 104 : index
    %c0_27 = arith.constant 0 : index
    %59 = vector.load %arg2[%c104, %c0_27] : memref<176x33xf32, #tpu.memory_space<vmem>>, vector<25x32xf32>
    %60 = arith.truncf %59 : vector<25x32xf32> to vector<25x32xbf16>
    %61 = arith.truncf %58 : vector<32x256xf32> to vector<32x256xbf16>
    %cst_28 = arith.constant dense<0.000000e+00> : vector<25x256xf32>
    %62 = tpu.matmul %60, %61, %cst_28 {dimension_numbers = #tpu.dot_dimension_numbers<[1], [0], [0], [1], [0, 0, 1, 1], [], []>} : vector<25x32xbf16>, vector<32x256xbf16>, vector<25x256xf32> -> vector<25x256xf32>
    %c104_29 = arith.constant 104 : index
    %c32_30 = arith.constant 32 : index
    %63 = vector.load %arg2[%c104_29, %c32_30] : memref<176x33xf32, #tpu.memory_space<vmem>>, vector<25x1xf32>
    %64 = vector.broadcast %63 : vector<25x1xf32> to vector<25x256xf32>
    %65 = arith.addf %62, %64 : vector<25x256xf32>
    %cst_31 = arith.constant 1.000000e+02 : f32
    %66 = vector.broadcast %cst_31 : f32 to vector<25x256xf32>
    %67 = arith.mulf %66, %65 : vector<25x256xf32>
    %cst_32 = arith.constant 2.000000e+01 : f32
    %68 = vector.broadcast %cst_32 : f32 to vector<25x256xf32>
    %69 = arith.cmpf ogt, %67, %68 : vector<25x256xf32>
    %70 = math.exp %67 : vector<25x256xf32>
    %71 = math.log1p %70 : vector<25x256xf32>
    %cst_33 = arith.constant 0.00999999977 : f32
    %72 = vector.broadcast %cst_33 : f32 to vector<25x256xf32>
    %73 = arith.mulf %71, %72 : vector<25x256xf32>
    %74 = arith.select %69, %65, %73 : vector<25x256xi1>, vector<25x256xf32>
    %c136 = arith.constant 136 : index
    %c0_34 = arith.constant 0 : index
    %75 = vector.load %arg2[%c136, %c0_34] : memref<176x33xf32, #tpu.memory_space<vmem>>, vector<32x25xf32>
    %76 = arith.truncf %75 : vector<32x25xf32> to vector<32x25xbf16>
    %77 = arith.truncf %74 : vector<25x256xf32> to vector<25x256xbf16>
    %cst_35 = arith.constant dense<0.000000e+00> : vector<32x256xf32>
    %78 = tpu.matmul %76, %77, %cst_35 {dimension_numbers = #tpu.dot_dimension_numbers<[1], [0], [0], [1], [0, 0, 1, 1], [], []>} : vector<32x25xbf16>, vector<25x256xbf16>, vector<32x256xf32> -> vector<32x256xf32>
    %79 = vector.extract_strided_slice %45 {offsets = [32, 0], sizes = [32, 256], strides = [1, 1]} : vector<64x256xf32> to vector<32x256xf32>
    %80 = arith.addf %78, %79 : vector<32x256xf32>
    %c136_36 = arith.constant 136 : index
    %c32_37 = arith.constant 32 : index
    %81 = vector.load %arg2[%c136_36, %c32_37] : memref<176x33xf32, #tpu.memory_space<vmem>>, vector<32x1xf32>
    %82 = vector.broadcast %81 : vector<32x1xf32> to vector<32x256xf32>
    %83 = arith.addf %80, %82 : vector<32x256xf32>
    %cst_38 = arith.constant 1.000000e+02 : f32
    %84 = vector.broadcast %cst_38 : f32 to vector<32x256xf32>
    %85 = arith.mulf %84, %83 : vector<32x256xf32>
    %cst_39 = arith.constant 2.000000e+01 : f32
    %86 = vector.broadcast %cst_39 : f32 to vector<32x256xf32>
    %87 = arith.cmpf ogt, %85, %86 : vector<32x256xf32>
    %88 = math.exp %85 : vector<32x256xf32>
    %89 = math.log1p %88 : vector<32x256xf32>
    %cst_40 = arith.constant 0.00999999977 : f32
    %90 = vector.broadcast %cst_40 : f32 to vector<32x256xf32>
    %91 = arith.mulf %89, %90 : vector<32x256xf32>
    %92 = arith.select %87, %83, %91 : vector<32x256xi1>, vector<32x256xf32>
    %c168 = arith.constant 168 : index
    %c0_41 = arith.constant 0 : index
    %93 = vector.load %arg2[%c168, %c0_41] : memref<176x33xf32, #tpu.memory_space<vmem>>, vector<1x32xf32>
    %94 = arith.truncf %93 : vector<1x32xf32> to vector<1x32xbf16>
    %95 = arith.truncf %92 : vector<32x256xf32> to vector<32x256xbf16>
    %cst_42 = arith.constant dense<0.000000e+00> : vector<1x256xf32>
    %96 = tpu.matmul %94, %95, %cst_42 {dimension_numbers = #tpu.dot_dimension_numbers<[1], [0], [0], [1], [0, 0, 1, 1], [], []>} : vector<1x32xbf16>, vector<32x256xbf16>, vector<1x256xf32> -> vector<1x256xf32>
    %c168_43 = arith.constant 168 : index
    %c32_44 = arith.constant 32 : index
    %97 = vector.load %arg2[%c168_43, %c32_44] : memref<176x33xf32, #tpu.memory_space<vmem>>, vector<1x1xf32>
    %98 = vector.broadcast %97 : vector<1x1xf32> to vector<1x256xf32>
    %99 = arith.addf %96, %98 : vector<1x256xf32>
    %c0_45 = arith.constant 0 : index
    %c0_46 = arith.constant 0 : index
    %100 = vector.load %arg3[%c0_45, %c0_46] : memref<1x256xf32, #tpu.memory_space<vmem>>, vector<1x256xf32>
    tpu.vector_store %arg3[%c0_45, %c0_46], %99 {strides = array<i32>} : memref<1x256xf32, #tpu.memory_space<vmem>>, vector<1x256xf32>,
    return
  }
  func.func @transform_0(%arg0: i32) -> (i32, i32) {
    %c0_i32 = arith.constant 0 : i32
    %c0_i32_0 = arith.constant 0 : i32
    return %c0_i32, %arg0 : i32, i32
  }
  func.func @transform_1(%arg0: i32) -> (i32, i32) {
    %c0_i32 = arith.constant 0 : i32
    %c0_i32_0 = arith.constant 0 : i32
    %c0_i32_1 = arith.constant 0 : i32
    return %c0_i32, %c0_i32_0 : i32, i32
  }
  func.func @transform_2(%arg0: i32) -> (i32, i32) {
    %c0_i32 = arith.constant 0 : i32
    %c0_i32_0 = arith.constant 0 : i32
    return %c0_i32, %arg0 : i32, i32
  }
}

</mosaic_0001>

<bundles_post_ra>
// kernel: tpu_custom_call.1
= control target key start
LH: loop header
LB: loop body
LE: loop exit
PB: predicated region body
PF: predicated region fallthrough
CT: control target
= control target key end

     0   :  { %vm42_vm0 = vcmask 1043456   ;;  %v1188_v2 = vmov 32   ;;  %s1811_s0 = inlined_call_operand.vmem [shape: f32[32,256], index: 0, kind: input, shape index: {}]   ;;  %s1812_s1 = inlined_call_operand.vmem [shape: f32[176,33], index: 1, kind: input, shape index: {}]   ;;  %s1813_s2 = inlined_call_operand.hbm [shape: f32[1,256], index: 2, kind: output, shape index: {}]  }
   0x1   :  { %v25_v0 = vld [vmem:[%s1812_s1] sm:$0xff]  ;;  %v19_v1 = vld [vmem:[%s1811_s0 + $0x30] sm:$0xff]  ;;  %1028 = vset.pattern.permute.xlu0 %v1188_v2  ;;  %v20_v4 = vld [vmem:[%s1811_s0 + $0x38] sm:$0xff]  ;;  %1029 = vset.pattern.permute.xlu1 %v1188_v2 }
   0x2   :  { %v23_v3 = vpack.c.bf16 %v19_v1, %v19_v1  ;;  %v15_v5 = vld [vmem:[%s1811_s0 + $0x10] sm:$0xff]  ;;  %v17_v6 = vld [vmem:[%s1811_s0 + $0x20] sm:$0xff]  ;;  %30 = vperm.xlu0 %1028, %v25_v0   ;;  %v24_v7 = vpack.c.bf16 %v20_v4, %v20_v4  ;;  %v16_v8 = vld [vmem:[%s1811_s0 + $0x18] sm:$0xff]  ;;  %1030 = vset.pattern.permute.xlu2 %v1188_v2 }
   0x3   :  { %v18_v9 = vld [vmem:[%s1811_s0 + $0x28] sm:$0xff]  ;;  %v21_v13 = vpack.c.bf16 %v17_v6, %v15_v5 }
   0x4   :  { %v44_v10 = vsel %vm42_vm0, %v23_v3, 0  ;;  %v26_v11 = vld [vmem:[%s1812_s1 + $0x8] sm:$0xff]  ;;  %v47_v12 = vsel %vm42_vm0, %v24_v7, 0 }
   0x5   :  { %55 = vmatpush.bf16.msra.mxu0 %v44_v10 }
   0x6   :  { %7 = vsyncpa [#allocation3], 0  ;;  %69 = vmatpush.bf16.msra.mxu1 %v47_v12  ;;  %v22_v14 = vpack.c.bf16 %v18_v9, %v16_v8  ;;  %v27_v15 = vpack.c.bf16 %v26_v11, %v25_v0  ;;  %vm38_vm1 = vcmask 195584   ;;  %v1235_v16 = vld [vmem:[%s1812_s1 + $0x40] sm:$0xff]  ;;  %v1241_v17 = vld [vmem:[%s1812_s1 + $0x78] sm:$0xff]  ;;  %vm152_vm10 = vcmask 130048  }
   0x7   :  { %v1247_v18 = vld [vmem:[%s1812_s1 + $0x70] sm:$0xff]  ;;  %v722_v19 = vld [vmem:[%s1812_s1 + $0x88] sm:$0xff]  ;;  %v1262_v21 = vld [vmem:[%s1812_s1 + $0x18] sm:$0xff]  ;;  %s992_s21 = sshll.u32 %s1813_s2, 4  ;;  %s993_s21 = int_to_ptr.hbm [resolvable:$true] %s992_s21 }
   0x8   :  { %v1256_v20 = vld [vmem:[%s1812_s1 + $0x10] sm:$0xff]  ;;  %v1268_v23 = vld [vmem:[%s1812_s1 + $0x28] sm:$0xff]  ;;  %v1293_v38 = vld [vmem:[%s1812_s1 + $0x80] sm:$0x1] }
   0x9   :  { %56 = vmatpush.bf16.msra.mxu0 %v21_v13  ;;  %144 = vperm.xlu1 %1029, %v1256_v20   ;;  %v724_v46 = vld [vmem:[%s1812_s1 + $0x98] sm:$0xff]  ;;  %v1307_v62 = vld [vmem:[%s1812_s1 + $0x90] sm:$0xff] }
   0xa   :  { %70 = vmatpush.bf16.msra.mxu1 %v22_v14  ;;  %35 = vperm.xlu0 %1028, %v26_v11  }
   0xc   :  { %1001 = vmatmul.msk.bf16.vlgmr.msra.gmra.mxu0 %vm38_vm1, %v27_v15 }
   0xd   :  { %1002 = vmatmul.msk.bf16.vlgmr.msra.gmra.mxu1 %vm38_vm1, %v27_v15 }
  0x11   :  { %149 = vperm.xlu1 %1029, %v1262_v21  }
  0x12   :  { %396 = vperm.xlu0 %1028, %v1235_v16  }
  0x19   :  { %381 = vperm.xlu1 %1029, %v1268_v23  }
  0x1a   :  { %549 = vperm.xlu0 %1028, %v1241_v17  }
  0x21   :  { %554 = vperm.xlu1 %1029, %v1293_v38  }
  0x22   :  { %544 = vperm.xlu0 %1028, %v1247_v18  }
  0x29   :  { %798 = vperm.xlu1 %1029, %v724_v46  }
  0x2a   :  { %788 = vperm.xlu0 %1028, %v722_v19  }
  0x31   :  { %793 = vperm.xlu1 %1029, %v1307_v62  }
  0x74   :  { %v31_v22 = vpop.permute.xlu0 %30 }
  0x7c   :  { %v36_v32 = vpop.permute.xlu0 %35 }
  0x89   :  { %v58_v24 = vpop.f32.mrf.mxu0 }
  0x8a   :  { %v1270_v25 = vadd.f32 %v58_v24, %v31_v22  ;;  %v72_v26 = vpop.f32.mrf.mxu1 }
  0x8b   :  { %v1273_v27 = vadd.f32 %v72_v26, %v31_v22 }
  0x8c   :  { %v1276_v28 = vmul.f32 100.0, %v1270_v25 }
  0x8d   :  { %v1279_v29 = vmul.f32 100.0, %v1273_v27 }
  0x8e   :  { %v85_v30 = vmul.f32 1.442695, %v1276_v28  ;;  %vm81_vm6 = vcmp.gt.f32.partialorder %v1276_v28, 20.0 }
  0x8f   :  { %v87_v31 = vmul.f32 1.442695, %v1279_v29  ;;  %vm82_vm8 = vcmp.gt.f32.partialorder %v1279_v29, 20.0 }
  0x90   :  { %1031 = vpow2.f32 %v85_v30 }
  0x91   :  { %1033 = vpow2.f32 %v87_v31  ;;  %v60_v33 = vpop.f32.mrf.mxu0 }
  0x92   :  { %v1283_v34 = vadd.f32 %v60_v33, %v36_v32  ;;  %v74_v35 = vpop.f32.mrf.mxu1 }
  0x93   :  { %v1285_v36 = vadd.f32 %v74_v35, %v36_v32 }
  0x94   :  { %v1288_v37 = vmul.f32 100.0, %v1283_v34 }
  0x95   :  { %v1296_v39 = vmul.f32 100.0, %v1285_v36 }
  0x96   :  { %v1032_v40 = vpop.eup %1031  ;;  %v89_v41 = vmul.f32 1.442695, %v1288_v37  ;;  %vm83_vm7 = vcmp.gt.f32.partialorder %v1288_v37, 20.0 }
  0x97   :  { %v1034_v42 = vpop.eup %1033  ;;  %v91_v43 = vmul.f32 1.442695, %v1296_v39  ;;  %v93_v44 = vadd.f32 1.0, %v1032_v40  ;;  %v96_v47 = vmul.f32 -0.5, %v1032_v40  ;;  %v99_v57 = vand.u32 2147483647, %v1032_v40 }
  0x98   :  { %1035 = vpow2.f32 %v89_v41  ;;  %v102_v45 = vadd.f32 1.0, %v1034_v42  ;;  %v105_v48 = vmul.f32 -0.5, %v1034_v42  ;;  %v108_v61 = vand.u32 2147483647, %v1034_v42 }
  0x99   :  { %1037 = vpow2.f32 %v91_v43  ;;  %v97_v53 = vadd.f32 1.0, %v96_v47  ;;  %vm100_vm2 = vcmp.lt.f32.partialorder %v99_v57, 0.0004427343  ;;  %vm84_vm9 = vcmp.gt.f32.partialorder %v1296_v39, 20.0  ;;  %v1337_v43 = vld [vmem:[%s1812_s1 + $0x20] sm:$0xff] }
  0x9a   :  { %1039 = vlog2.f32 %v93_v44  ;;  %v106_v58 = vadd.f32 1.0, %v105_v48  ;;  %vm109_vm3 = vcmp.lt.f32.partialorder %v108_v61, 0.0004427343  ;;  %250 = vperm.xlu2 %1030, %v1337_v43   ;;  %v1361_v61 = vld [vmem:[%s1812_s1 + $0x30] sm:$0xff] }
  0x9b   :  { %1041 = vlog2.f32 %v102_v45  ;;  %v98_v0 = vmul.f32 %v1032_v40, %v97_v53  ;;  %v139_v40 = vpack.c.bf16 %v1262_v21, %v1256_v20 }
  0x9c   :  { %v107_v3 = vmul.f32 %v1034_v42, %v106_v58 }
  0x9e   :  { %v1036_v49 = vpop.eup %1035 }
  0x9f   :  { %v1038_v50 = vpop.eup %1037  ;;  %v111_v51 = vadd.f32 1.0, %v1036_v49  ;;  %v114_v54 = vmul.f32 -0.5, %v1036_v49  ;;  %v117_v2 = vand.u32 2147483647, %v1036_v49 }
  0xa0   :  { %v1040_v52 = vpop.eup %1039  ;;  %v120_v55 = vadd.f32 1.0, %v1038_v50  ;;  %v123_v59 = vmul.f32 -0.5, %v1038_v50  ;;  %v126_v6 = vand.u32 2147483647, %v1038_v50 }
  0xa1   :  { %v1042_v56 = vpop.eup %1041  ;;  %1043 = vlog2.f32 %v111_v51  ;;  %v95_v60 = vmul.f32 0.6931472, %v1040_v52  ;;  %v115_v1 = vadd.f32 1.0, %v114_v54  ;;  %vm118_vm4 = vcmp.lt.f32.partialorder %v117_v2, 0.0004427343  ;;  %v1355_v54 = vld [vmem:[%s1812_s1 + $0x38] sm:$0xff] }
  0xa2   :  { %1045 = vlog2.f32 %v120_v55  ;;  %v104_v63 = vmul.f32 0.6931472, %v1042_v56  ;;  %v124_v4 = vadd.f32 1.0, %v123_v59  ;;  %vm127_vm5 = vcmp.lt.f32.partialorder %v126_v6, 0.0004427343  ;;  %391 = vperm.xlu2 %1030, %v1355_v54  }
  0xa3   :  { %v101_v5 = vsel %vm100_vm2, %v98_v0, %v95_v60  ;;  %v116_v11 = vmul.f32 %v1036_v49, %v115_v1 }
  0xa4   :  { %v110_v8 = vsel %vm109_vm3, %v107_v3, %v104_v63  ;;  %v129_v12 = vmul.f32 0.01, %v101_v5  ;;  %v125_v14 = vmul.f32 %v1038_v50, %v124_v4 }
  0xa5   :  { %v130_v19 = vmul.f32 0.01, %v110_v8 }
  0xa6   :  { %v133_v30 = vsel %vm81_vm6, %v1270_v25, %v129_v12  ;;  %v145_v25 = vpop.permute.xlu1 %144 }
  0xa7   :  { %v1044_v7 = vpop.eup %1043  ;;  %v134_v33 = vsel %vm82_vm8, %v1273_v27, %v130_v19 }
  0xa8   :  { %v1046_v9 = vpop.eup %1045  ;;  %v113_v10 = vmul.f32 0.6931472, %v1044_v7 }
  0xa9   :  { %v122_v13 = vmul.f32 0.6931472, %v1046_v9 }
  0xaa   :  { %v119_v15 = vsel %vm118_vm4, %v116_v11, %v113_v10  ;;  %386 = vperm.xlu2 %1030, %v1361_v61   ;;  %vm298_vm4 = vcmask 64512  }
  0xab   :  { %v131_v22 = vmul.f32 0.01, %v119_v15  ;;  %v128_v24 = vsel %vm127_vm5, %v125_v14, %v122_v13 }
  0xac   :  { %v132_v26 = vmul.f32 0.01, %v128_v24 }
  0xad   :  { %v135_v31 = vsel %vm83_vm7, %v1283_v34, %v131_v22 }
  0xae   :  { %v140_v32 = vpack.c.bf16 %v135_v31, %v133_v30  ;;  %v136_v35 = vsel %vm84_vm9, %v1285_v36, %v132_v26  ;;  %v150_v41 = vpop.permute.xlu1 %149  ;;  %v1367_v26 = vld [vmem:[%s1812_s1 + $0x68] sm:$0xff] }
  0xaf   :  { %v141_v28 = vpack.c.bf16 %v136_v35, %v134_v33 }
  0xb0   :  { %163 = vmatpush.bf16.msra.mxu2 %v140_v32 }
  0xb1   :  { %177 = vmatpush.bf16.msra.mxu3 %v141_v28 }
  0xb2   :  { %539 = vperm.xlu2 %1030, %v1367_v26  }
  0xb3   :  { %1003 = vmatmul.msk.bf16.vlgmr.msra.gmra.mxu2 %vm152_vm10, %v139_v40 }
  0xb4   :  { %1004 = vmatmul.msk.bf16.vlgmr.msra.gmra.mxu3 %vm152_vm10, %v139_v40 }
 0x136   :  { %v165_v29 = vpop.f32.mrf.mxu2 }
 0x137   :  { %v1322_v34 = vadd.f32 %v165_v29, %v145_v25  ;;  %v179_v37 = vpop.f32.mrf.mxu3 }
 0x138   :  { %v1324_v39 = vadd.f32 %v179_v37, %v145_v25 }
 0x139   :  { %v1327_v27 = vmul.f32 100.0, %v1322_v34 }
 0x13a   :  { %v1330_v20 = vmul.f32 100.0, %v1324_v39 }
 0x13b   :  { %v192_v21 = vmul.f32 1.442695, %v1327_v27  ;;  %vm188_vm15 = vcmp.gt.f32.partialorder %v1327_v27, 20.0  ;;  %v245_v27 = vpack.c.bf16 %v1337_v43, %v1337_v43 }
 0x13c   :  { %v194_v36 = vmul.f32 1.442695, %v1330_v20  ;;  %vm189_vm2 = vcmp.gt.f32.partialorder %v1330_v20, 20.0  ;;  %v13_v20 = vld [vmem:[%s1811_s0] sm:$0xff] }
 0x13d   :  { %1047 = vpow2.f32 %v192_v21 }
 0x13e   :  { %1049 = vpow2.f32 %v194_v36  ;;  %v167_v42 = vpop.f32.mrf.mxu2 }
 0x13f   :  { %v1339_v44 = vadd.f32 %v167_v42, %v150_v41  ;;  %v181_v45 = vpop.f32.mrf.mxu3 }
 0x140   :  { %v1342_v46 = vadd.f32 %v181_v45, %v150_v41 }
 0x141   :  { %v1345_v47 = vmul.f32 100.0, %v1339_v44 }
 0x142   :  { %v1348_v48 = vmul.f32 100.0, %v1342_v46 }
 0x143   :  { %v1048_v49 = vpop.eup %1047  ;;  %v196_v50 = vmul.f32 1.442695, %v1345_v47  ;;  %vm190_vm1 = vcmp.gt.f32.partialorder %v1345_v47, 20.0  ;;  %v1383_v47 = vld [vmem:[%s1812_s1 + $0xa0] sm:$0xff] }
 0x144   :  { %v1050_v51 = vpop.eup %1049  ;;  %v198_v52 = vmul.f32 1.442695, %v1348_v48  ;;  %v200_v53 = vadd.f32 1.0, %v1048_v49  ;;  %v203_v56 = vmul.f32 -0.5, %v1048_v49  ;;  %v206_v4 = vand.u32 2147483647, %v1048_v49  ;;  %803 = vperm.xlu2 %1030, %v1383_v47  }
 0x145   :  { %1051 = vpow2.f32 %v196_v50  ;;  %v209_v55 = vadd.f32 1.0, %v1050_v51  ;;  %v212_v57 = vmul.f32 -0.5, %v1050_v51  ;;  %v215_v8 = vand.u32 2147483647, %v1050_v51 }
 0x146   :  { %1053 = vpow2.f32 %v198_v52  ;;  %v204_v0 = vadd.f32 1.0, %v203_v56  ;;  %vm207_vm11 = vcmp.lt.f32.partialorder %v206_v4, 0.0004427343  ;;  %vm191_vm3 = vcmp.gt.f32.partialorder %v1348_v48, 20.0 }
 0x147   :  { %1055 = vlog2.f32 %v200_v53  ;;  %v213_v5 = vadd.f32 1.0, %v212_v57  ;;  %vm216_vm12 = vcmp.lt.f32.partialorder %v215_v8, 0.0004427343 }
 0x148   :  { %1057 = vlog2.f32 %v209_v55  ;;  %v205_v10 = vmul.f32 %v1048_v49, %v204_v0  ;;  %v295_v0 = vpack.c.bf16 %v1235_v16, %v1355_v54 }
 0x149   :  { %v214_v13 = vmul.f32 %v1050_v51, %v213_v5 }
 0x14b   :  { %v1052_v58 = vpop.eup %1051 }
 0x14c   :  { %v1054_v59 = vpop.eup %1053  ;;  %v218_v60 = vadd.f32 1.0, %v1052_v58  ;;  %v221_v1 = vmul.f32 -0.5, %v1052_v58  ;;  %v224_v12 = vand.u32 2147483647, %v1052_v58 }
 0x14d   :  { %v1056_v63 = vpop.eup %1055  ;;  %v227_v2 = vadd.f32 1.0, %v1054_v59  ;;  %v230_v6 = vmul.f32 -0.5, %v1054_v59  ;;  %v233_v19 = vand.u32 2147483647, %v1054_v59 }
 0x14e   :  { %v1058_v3 = vpop.eup %1057  ;;  %1059 = vlog2.f32 %v218_v60  ;;  %v202_v7 = vmul.f32 0.6931472, %v1056_v63  ;;  %v222_v11 = vadd.f32 1.0, %v221_v1  ;;  %vm225_vm13 = vcmp.lt.f32.partialorder %v224_v12, 0.0004427343 }
 0x14f   :  { %1061 = vlog2.f32 %v227_v2  ;;  %v211_v9 = vmul.f32 0.6931472, %v1058_v3  ;;  %v231_v14 = vadd.f32 1.0, %v230_v6  ;;  %vm234_vm14 = vcmp.lt.f32.partialorder %v233_v19, 0.0004427343  ;;  %v382_v2 = vpop.permute.xlu1 %381 }
 0x150   :  { %v208_v15 = vsel %vm207_vm11, %v205_v10, %v202_v7  ;;  %v223_v32 = vmul.f32 %v1052_v58, %v222_v11  ;;  %v294_v58 = vpack.c.bf16 %v1361_v61, %v1268_v23 }
 0x151   :  { %v217_v24 = vsel %vm216_vm12, %v214_v13, %v211_v9  ;;  %v236_v33 = vmul.f32 0.01, %v208_v15  ;;  %v232_v40 = vmul.f32 %v1054_v59, %v231_v14 }
 0x152   :  { %v237_v25 = vmul.f32 0.01, %v217_v24 }
 0x153   :  { %v240_v36 = vsel %vm188_vm15, %v1322_v34, %v236_v33  ;;  %v934_v34 = vld [vmem:[%s1812_s1 + $0xa8] sm:$0x1] }
 0x154   :  { %v1060_v22 = vpop.eup %1059  ;;  %v241_v45 = vsel %vm189_vm2, %v1324_v39, %v237_v25  ;;  %942 = vperm.xlu2 %1030, %v934_v34   ;;  %v251_v39 = vpop.permute.xlu2 %250 }
 0x155   :  { %v1062_v30 = vpop.eup %1061  ;;  %v220_v31 = vmul.f32 0.6931472, %v1060_v22 }
 0x156   :  { %v229_v35 = vmul.f32 0.6931472, %v1062_v30 }
 0x157   :  { %v226_v28 = vsel %vm225_vm13, %v223_v32, %v220_v31 }
 0x158   :  { %v238_v29 = vmul.f32 0.01, %v226_v28  ;;  %v235_v37 = vsel %vm234_vm14, %v232_v40, %v229_v35  ;;  %v397_v28 = vpop.permute.xlu0 %396 }
 0x159   :  { %v239_v21 = vmul.f32 0.01, %v235_v37 }
 0x15a   :  { %v242_v41 = vsel %vm190_vm1, %v1339_v44, %v238_v29 }
 0x15b   :  { %v246_v42 = vpack.c.bf16 %v242_v41, %v240_v36  ;;  %v243_v49 = vsel %vm191_vm3, %v1342_v46, %v239_v21  ;;  %v14_v46 = vld [vmem:[%s1811_s0 + $0x8] sm:$0xff] }
 0x15c   :  { %v247_v50 = vpack.c.bf16 %v243_v49, %v241_v45  ;;  %v392_v1 = vpop.permute.xlu2 %391 }
 0x15d   :  { %263 = vmatpush.bf16.msrb.mxu2 %v246_v42 }
 0x15e   :  { %276 = vmatpush.bf16.msrb.mxu3 %v247_v50 }
 0x160   :  { %1005 = vmatmul.msk.bf16.vlgmr.msrb.gmra.mxu2 %vm152_vm10, %v245_v27 }
 0x161   :  { %1006 = vmatmul.msk.bf16.vlgmr.msrb.gmra.mxu3 %vm152_vm10, %v245_v27 }
 0x164   :  { %v387_v4 = vpop.permute.xlu2 %386 }
 0x1e3   :  { %v265_v43 = vpop.f32.mrf.mxu2 }
 0x1e4   :  { %v266_v44 = vadd.f32 %v265_v43, %v251_v39  ;;  %v278_v48 = vpop.f32.mrf.mxu3 }
 0x1e5   :  { %v279_v51 = vadd.f32 %v278_v48, %v251_v39 }
 0x1e6   :  { %v282_v52 = vadd.f32 %v266_v44, %v13_v20 }
 0x1e7   :  { %v283_v53 = vadd.f32 %v279_v51, %v14_v46 }
 0x1e8   :  { %v284_v55 = vpack.c.bf16 %v282_v52, %v282_v52 }
 0x1e9   :  { %v285_v56 = vpack.c.bf16 %v283_v53, %v283_v53 }
 0x1ea   :  { %v312_v57 = vsel %vm42_vm0, %v284_v55, 0 }
 0x1eb   :  { %v267_v59 = vpop.f32.mrf.mxu2  ;;  %324 = vmatpush.bf16.msrb.mxu0 %v312_v57  ;;  %v315_v60 = vsel %vm42_vm0, %v285_v56, 0 }
 0x1ec   :  { %v280_v63 = vpop.f32.mrf.mxu3  ;;  %353 = vmatpush.bf16.msrb.mxu1 %v315_v60 }
 0x1ee   :  { %1007 = vmatmul.msk.bf16.vlgmr.msrb.gmra.mxu0 %vm298_vm4, %v294_v58 }
 0x1ef   :  { %1011 = vmatmul.msk.bf16.vlgmr.msrb.gmra.mxu1 %vm298_vm4, %v294_v58 }
 0x1fe   :  { %1008 = vmatmul.msk.bf16.gmra.mxu0 %vm298_vm4, %v295_v0 }
 0x1ff   :  { %1012 = vmatmul.msk.bf16.gmra.mxu1 %vm298_vm4, %v295_v0 }
 0x26b   :  { %v326_v23 = vpop.f32.mrf.mxu0 }
 0x26c   :  { %v355_v61 = vpop.f32.mrf.mxu1  ;;  %v1407_v3 = vadd.f32 %v382_v2, %v326_v23 }
 0x26d   :  { %v1412_v7 = vadd.f32 %v382_v2, %v355_v61 }
 0x26e   :  { %v1410_v6 = vmul.f32 100.0, %v1407_v3 }
 0x26f   :  { %v1423_v11 = vmul.f32 100.0, %v1412_v7 }
 0x270   :  { %v423_v10 = vmul.f32 1.442695, %v1410_v6  ;;  %vm415_vm3 = vcmp.gt.f32.partialorder %v1410_v6, 20.0 }
 0x271   :  { %v425_v15 = vmul.f32 1.442695, %v1423_v11 }
 0x272   :  { %1063 = vpow2.f32 %v423_v10 }
 0x273   :  { %v328_v5 = vpop.f32.mrf.mxu0 }
 0x274   :  { %v1414_v8 = vadd.f32 %v387_v4, %v328_v5  ;;  %v357_v16 = vpop.f32.mrf.mxu1 }
 0x275   :  { %v1416_v54 = vadd.f32 %v387_v4, %v357_v16 }
 0x276   :  { %v1419_v9 = vmul.f32 100.0, %v1414_v8 }
 0x277   :  { %v1426_v12 = vmul.f32 100.0, %v1416_v54 }
 0x278   :  { %v427_v13 = vmul.f32 1.442695, %v1419_v9  ;;  %v1064_v40 = vpop.eup %1063  ;;  %vm417_vm15 = vcmp.gt.f32.partialorder %v1419_v9, 20.0 }
 0x279   :  { %v429_v24 = vmul.f32 1.442695, %v1426_v12  ;;  %v439_v41 = vadd.f32 1.0, %v1064_v40  ;;  %v442_v46 = vmul.f32 -0.5, %v1064_v40  ;;  %v445_v55 = vand.u32 2147483647, %v1064_v40 }
 0x27a   :  { %1065 = vpow2.f32 %v427_v13 }
 0x27b   :  { %v331_v14 = vpop.f32.mrf.mxu0  ;;  %1067 = vpow2.f32 %v425_v15  ;;  %v443_v57 = vadd.f32 1.0, %v442_v46  ;;  %vm1466_vm5 = vcmp.lt.f32.partialorder %v445_v55, 0.0004427343 }
 0x27c   :  { %v1430_v19 = vadd.f32 %v392_v1, %v331_v14  ;;  %v360_v22 = vpop.f32.mrf.mxu1  ;;  %1069 = vpow2.f32 %v429_v24 }
 0x27d   :  { %v1433_v30 = vadd.f32 %v392_v1, %v360_v22  ;;  %v444_v13 = vmul.f32 %v1064_v40, %v443_v57 }
 0x27e   :  { %v1436_v31 = vmul.f32 100.0, %v1430_v19 }
 0x27f   :  { %v1439_v32 = vmul.f32 100.0, %v1433_v30 }
 0x280   :  { %v431_v33 = vmul.f32 1.442695, %v1436_v31  ;;  %v1445_v21 = vpop.eup %1065  ;;  %vm419_vm12 = vcmp.gt.f32.partialorder %v1436_v31, 20.0 }
 0x281   :  { %v433_v35 = vmul.f32 1.442695, %v1439_v32  ;;  %v1068_v42 = vpop.eup %1067  ;;  %v457_v39 = vadd.f32 1.0, %v1445_v21  ;;  %v460_v59 = vmul.f32 -0.5, %v1445_v21  ;;  %v463_v14 = vand.u32 2147483647, %v1445_v21 }
 0x282   :  { %1071 = vpow2.f32 %v431_v33  ;;  %v1452_v49 = vpop.eup %1069  ;;  %v448_v51 = vadd.f32 1.0, %v1068_v42  ;;  %v451_v52 = vmul.f32 -0.5, %v1068_v42  ;;  %v454_v0 = vand.u32 2147483647, %v1068_v42 }
 0x283   :  { %1073 = vpow2.f32 %v433_v35  ;;  %v333_v25 = vpop.f32.mrf.mxu0  ;;  %v466_v53 = vadd.f32 1.0, %v1452_v49  ;;  %v469_v4 = vmul.f32 -0.5, %v1452_v49  ;;  %v461_v33 = vadd.f32 1.0, %v460_v59 }
 0x284   :  { %v1443_v29 = vadd.f32 %v397_v28, %v333_v25  ;;  %v362_v37 = vpop.f32.mrf.mxu1  ;;  %1075 = vlog2.f32 %v439_v41  ;;  %v452_v63 = vadd.f32 1.0, %v451_v52  ;;  %v472_v41 = vand.u32 2147483647, %v1452_v49 }
 0x285   :  { %v1447_v36 = vadd.f32 %v397_v28, %v362_v37  ;;  %v470_v46 = vadd.f32 1.0, %v469_v4  ;;  %vm1474_vm6 = vcmp.lt.f32.partialorder %v454_v0, 0.0004427343  ;;  %v462_v57 = vmul.f32 %v1445_v21, %v461_v33  ;;  %v555_v21 = vpop.permute.xlu1 %554 }
 0x286   :  { %v1450_v45 = vmul.f32 100.0, %v1443_v29  ;;  %v453_v37 = vmul.f32 %v1068_v42, %v452_v63  ;;  %vm1487_vm8 = vcmp.lt.f32.partialorder %v463_v14, 0.0004427343  ;;  %vm1501_vm11 = vcmp.lt.f32.partialorder %v472_v41, 0.0004427343 }
 0x287   :  { %v1455_v50 = vmul.f32 100.0, %v1447_v36  ;;  %v471_v14 = vmul.f32 %v1452_v49, %v470_v46  ;;  %vm420_vm1 = vcmp.gt.f32.partialorder %v1439_v32, 20.0 }
 0x288   :  { %v1072_v27 = vpop.eup %1071  ;;  %v435_v34 = vmul.f32 1.442695, %v1450_v45  ;;  %vm421_vm13 = vcmp.gt.f32.partialorder %v1450_v45, 20.0 }
 0x289   :  { %v1459_v20 = vpop.eup %1073  ;;  %v475_v43 = vadd.f32 1.0, %v1072_v27  ;;  %v437_v48 = vmul.f32 1.442695, %v1455_v50  ;;  %v478_v56 = vmul.f32 -0.5, %v1072_v27  ;;  %v481_v22 = vand.u32 2147483647, %v1072_v27 }
 0x28a   :  { %v484_v44 = vadd.f32 1.0, %v1459_v20  ;;  %1077 = vpow2.f32 %v435_v34  ;;  %v1076_v58 = vpop.eup %1075  ;;  %v487_v23 = vmul.f32 -0.5, %v1459_v20  ;;  %vm422_vm2 = vcmp.gt.f32.partialorder %v1455_v50, 20.0 }
 0x28b   :  { %1079 = vlog2.f32 %v475_v43  ;;  %v479_v16 = vadd.f32 1.0, %v478_v56  ;;  %v441_v24 = vmul.f32 0.6931472, %v1076_v58  ;;  %vm1478_vm7 = vcmp.lt.f32.partialorder %v481_v22, 0.0004427343 }
 0x28c   :  { %1081 = vlog2.f32 %v457_v39  ;;  %v488_v39 = vadd.f32 1.0, %v487_v23  ;;  %v531_v50 = vpack.c.bf16 %v1247_v18, %v1367_v26  ;;  %v550_v18 = vpop.permute.xlu0 %549 }
 0x28d   :  { %1083 = vpow2.f32 %v437_v48  ;;  %v480_v40 = vmul.f32 %v1072_v27, %v479_v16  ;;  %v447_v27 = vsel %vm1466_vm5, %v444_v13, %v441_v24  ;;  %vm418_vm5 = vcmp.gt.f32.partialorder %v1426_v12, 20.0 }
 0x28e   :  { %1085 = vlog2.f32 %v484_v44  ;;  %v511_v24 = vmul.f32 0.01, %v447_v27 }
 0x28f   :  { %1087 = vlog2.f32 %v448_v51  ;;  %v490_v51 = vand.u32 2147483647, %v1459_v20 }
 0x290   :  { %v1078_v60 = vpop.eup %1077  ;;  %1089 = vlog2.f32 %v466_v53 }
 0x291   :  { %v1080_v1 = vpop.eup %1079  ;;  %v493_v61 = vadd.f32 1.0, %v1078_v60  ;;  %v496_v10 = vmul.f32 -0.5, %v1078_v60  ;;  %v499_v56 = vand.u32 2147483647, %v1078_v60  ;;  %vm1494_vm9 = vcmp.lt.f32.partialorder %v490_v51, 0.0004427343 }
 0x292   :  { %v1082_v5 = vpop.eup %1081  ;;  %v477_v28 = vmul.f32 0.6931472, %v1080_v1  ;;  %v489_v1 = vmul.f32 %v1459_v20, %v488_v39 }
 0x293   :  { %v1084_v15 = vpop.eup %1083  ;;  %1091 = vlog2.f32 %v493_v61  ;;  %v459_v44 = vmul.f32 0.6931472, %v1082_v5  ;;  %v497_v52 = vadd.f32 1.0, %v496_v10  ;;  %vm500_vm10 = vcmp.lt.f32.partialorder %v499_v56, 0.0004427343 }
 0x294   :  { %v1086_v35 = vpop.eup %1085  ;;  %v502_v25 = vadd.f32 1.0, %v1084_v15  ;;  %v505_v43 = vmul.f32 -0.5, %v1084_v15  ;;  %v483_v58 = vsel %vm1478_vm7, %v480_v40, %v477_v28  ;;  %v508_v16 = vand.u32 2147483647, %v1084_v15 }
 0x295   :  { %v1088_v34 = vpop.eup %1087  ;;  %v486_v42 = vmul.f32 0.6931472, %v1086_v35  ;;  %v465_v61 = vsel %vm1487_vm8, %v462_v57, %v459_v44  ;;  %v498_v2 = vmul.f32 %v1078_v60, %v497_v52  ;;  %v515_v10 = vmul.f32 0.01, %v483_v58 }
 0x296   :  { %v1090_v48 = vpop.eup %1089  ;;  %1093 = vlog2.f32 %v502_v25  ;;  %v450_v63 = vmul.f32 0.6931472, %v1088_v34  ;;  %v506_v23 = vadd.f32 1.0, %v505_v43  ;;  %v513_v33 = vmul.f32 0.01, %v465_v61 }
 0x297   :  { %v468_v4 = vmul.f32 0.6931472, %v1090_v48  ;;  %v492_v13 = vsel %vm1494_vm9, %v489_v1, %v486_v42  ;;  %vm509_vm14 = vcmp.lt.f32.partialorder %v508_v16, 0.0004427343  ;;  %v523_v49 = vsel %vm419_vm12, %v1430_v19, %v515_v10 }
 0x298   :  { %v507_v34 = vmul.f32 %v1084_v15, %v506_v23  ;;  %v516_v39 = vmul.f32 0.01, %v492_v13  ;;  %v456_v44 = vsel %vm1474_vm6, %v453_v37, %v450_v63  ;;  %v521_v31 = vsel %vm417_vm15, %v1414_v8, %v513_v33 }
 0x299   :  { %v1092_v0 = vpop.eup %1091  ;;  %v474_v60 = vsel %vm1501_vm11, %v471_v14, %v468_v4  ;;  %v512_v45 = vmul.f32 0.01, %v456_v44  ;;  %v519_v37 = vsel %vm415_vm3, %v1407_v3, %v511_v24  ;;  %vm416_vm6 = vcmp.gt.f32.partialorder %v1423_v11, 20.0 }
 0x29a   :  { %v495_v5 = vmul.f32 0.6931472, %v1092_v0  ;;  %v514_v48 = vmul.f32 0.01, %v474_v60  ;;  %v524_v19 = vsel %vm420_vm1, %v1433_v30, %v516_v39  ;;  %v533_v40 = vpack.c.bf16 %v521_v31, %v519_v37 }
 0x29b   :  { %v520_v6 = vsel %vm416_vm6, %v1412_v7, %v512_v45  ;;  %vm557_vm7 = vcmask 261120   ;;  %v532_v3 = vpack.c.bf16 %v1293_v38, %v1241_v17  ;;  %v545_v7 = vpop.permute.xlu0 %544  ;;  %vm739_vm12 = vcmask 1044480  }
 0x29c   :  { %v1094_v20 = vpop.eup %1093  ;;  %v501_v22 = vsel %vm500_vm10, %v498_v2, %v495_v5  ;;  %v522_v32 = vsel %vm418_vm5, %v1416_v54, %v514_v48  ;;  %v540_v54 = vpop.permute.xlu2 %539  ;;  %v291_v48 = vld [vmem:[%s1812_s1 + $0x50] sm:$0xff] }
 0x29d   :  { %v517_v28 = vmul.f32 0.01, %v501_v22  ;;  %v504_v25 = vmul.f32 0.6931472, %v1094_v20  ;;  %v534_v8 = vpack.c.bf16 %v522_v32, %v520_v6 }
 0x29f   :  { %v525_v43 = vsel %vm421_vm13, %v1443_v29, %v517_v28  ;;  %v510_v41 = vsel %vm509_vm14, %v507_v34, %v504_v25 }
 0x2a0   :  { %v535_v15 = vpack.c.bf16 %v525_v43, %v523_v49  ;;  %v518_v46 = vmul.f32 0.01, %v510_v41 }
 0x2a2   :  { %v526_v29 = vsel %vm422_vm2, %v1447_v36, %v518_v46  ;;  %570 = vmatpush.bf16.msra.mxu2 %v535_v15  ;;  %v290_v46 = vld [vmem:[%s1812_s1 + $0x48] sm:$0xff] }
 0x2a3   :  { %v536_v9 = vpack.c.bf16 %v526_v29, %v524_v19 }
 0x2a5   :  { %589 = vmatpush.bf16.msra.mxu3 %v536_v9  ;;  %v296_v9 = vpack.c.bf16 %v291_v48, %v290_v46 }
 0x2a6   :  { %571 = vmatpush.bf16.msra.mxu2 %v533_v40 }
 0x2a7   :  { %1009 = vmatmul.msk.bf16.gmra.mxu0 %vm298_vm4, %v296_v9  ;;  %1013 = vmatmul.msk.bf16.gmra.mxu1 %vm298_vm4, %v296_v9 }
 0x2a9   :  { %590 = vmatpush.bf16.msra.mxu3 %v534_v8  ;;  %1015 = vmatmul.msk.bf16.vlgmr.msra.gmra.mxu2 %vm557_vm7, %v531_v50 }
 0x2ac   :  { %1017 = vmatmul.msk.bf16.vlgmr.msra.gmra.mxu3 %vm557_vm7, %v531_v50 }
 0x2b9   :  { %1016 = vmatmul.msk.bf16.gmra.mxu2 %vm557_vm7, %v532_v3 }
 0x2bc   :  { %1018 = vmatmul.msk.bf16.gmra.mxu3 %vm557_vm7, %v532_v3 }
 0x32c   :  { %v573_v26 = vpop.f32.mrf.mxu2 }
 0x32d   :  { %v1533_v12 = vadd.f32 %v573_v26, %v540_v54 }
 0x32f   :  { %v592_v11 = vpop.f32.mrf.mxu3  ;;  %v1536_v30 = vmul.f32 100.0, %v1533_v12 }
 0x330   :  { %v1540_v52 = vadd.f32 %v592_v11, %v540_v54 }
 0x331   :  { %v618_v38 = vmul.f32 1.442695, %v1536_v30 }
 0x332   :  { %v1547_v55 = vmul.f32 100.0, %v1540_v52 }
 0x333   :  { %1095 = vpow2.f32 %v618_v38 }
 0x334   :  { %v575_v36 = vpop.f32.mrf.mxu2  ;;  %v620_v27 = vmul.f32 1.442695, %v1547_v55 }
 0x335   :  { %v1538_v51 = vadd.f32 %v575_v36, %v545_v7 }
 0x337   :  { %v594_v17 = vpop.f32.mrf.mxu3  ;;  %v1544_v53 = vmul.f32 100.0, %v1538_v51 }
 0x338   :  { %v1549_v42 = vadd.f32 %v594_v17, %v545_v7 }
 0x339   :  { %v622_v57 = vmul.f32 1.442695, %v1544_v53  ;;  %v1096_v61 = vpop.eup %1095  ;;  %vm612_vm2 = vcmp.gt.f32.partialorder %v1544_v53, 20.0 }
 0x33a   :  { %v1559_v0 = vmul.f32 100.0, %v1549_v42  ;;  %v634_v13 = vadd.f32 1.0, %v1096_v61  ;;  %v637_v39 = vmul.f32 -0.5, %v1096_v61  ;;  %v640_v45 = vand.u32 2147483647, %v1096_v61 }
 0x33b   :  { %1097 = vpow2.f32 %v622_v57 }
 0x33c   :  { %v578_v56 = vpop.f32.mrf.mxu2  ;;  %1099 = vpow2.f32 %v620_v27  ;;  %v624_v5 = vmul.f32 1.442695, %v1559_v0  ;;  %v638_v29 = vadd.f32 1.0, %v637_v39  ;;  %vm1608_vm8 = vcmp.lt.f32.partialorder %v640_v45, 0.0004427343 }
 0x33d   :  { %v1552_v58 = vadd.f32 %v578_v56, %v550_v18 }
 0x33e   :  { %v1606_v11 = vmul.f32 %v1096_v61, %v638_v29 }
 0x33f   :  { %v1556_v59 = vmul.f32 100.0, %v1552_v58  ;;  %v597_v63 = vpop.f32.mrf.mxu3 }
 0x340   :  { %v1561_v1 = vadd.f32 %v597_v63, %v550_v18 }
 0x341   :  { %v626_v23 = vmul.f32 1.442695, %v1556_v59  ;;  %v1571_v14 = vpop.eup %1097  ;;  %vm614_vm10 = vcmp.gt.f32.partialorder %v1556_v59, 20.0 }
 0x342   :  { %v1565_v4 = vmul.f32 100.0, %v1561_v1  ;;  %v1576_v24 = vpop.eup %1099  ;;  %v652_v60 = vadd.f32 1.0, %v1571_v14  ;;  %v655_v40 = vmul.f32 -0.5, %v1571_v14  ;;  %v658_v18 = vand.u32 2147483647, %v1571_v14 }
 0x343   :  { %1101 = vpow2.f32 %v626_v23  ;;  %v643_v49 = vadd.f32 1.0, %v1576_v24  ;;  %v646_v32 = vmul.f32 -0.5, %v1576_v24  ;;  %v649_v56 = vand.u32 2147483647, %v1576_v24 }
 0x344   :  { %v628_v2 = vmul.f32 1.442695, %v1565_v4  ;;  %v580_v16 = vpop.f32.mrf.mxu2  ;;  %v656_v63 = vadd.f32 1.0, %v655_v40  ;;  %vm1618_vm9 = vcmp.lt.f32.partialorder %v658_v18, 0.0004427343  ;;  %vm615_vm5 = vcmp.gt.f32.partialorder %v1565_v4, 20.0 }
 0x345   :  { %v1569_v10 = vadd.f32 %v580_v16, %v555_v21  ;;  %v647_v23 = vadd.f32 1.0, %v646_v32  ;;  %vm650_vm3 = vcmp.lt.f32.partialorder %v649_v56, 0.0004427343  ;;  %v1159_v4 = vld [vmem:[%s1812_s1 + $0x88] sm:$0xff] }
 0x346   :  { %1103 = vpow2.f32 %v628_v2  ;;  %v657_v48 = vmul.f32 %v1571_v14, %v656_v63  ;;  %v293_v14 = vld [vmem:[%s1812_s1 + $0x60] sm:$0xff] }
 0x347   :  { %v1574_v20 = vmul.f32 100.0, %v1569_v10  ;;  %v599_v22 = vpop.f32.mrf.mxu3  ;;  %1105 = vpow2.f32 %v624_v5 }
 0x348   :  { %v1578_v33 = vadd.f32 %v599_v22, %v555_v21  ;;  %1107 = vlog2.f32 %v634_v13 }
 0x349   :  { %v1102_v35 = vpop.eup %1101  ;;  %v630_v28 = vmul.f32 1.442695, %v1574_v20  ;;  %vm616_vm14 = vcmp.gt.f32.partialorder %v1574_v20, 20.0 }
 0x34a   :  { %v670_v25 = vadd.f32 1.0, %v1102_v35  ;;  %v1582_v34 = vmul.f32 100.0, %v1578_v33  ;;  %v673_v19 = vmul.f32 -0.5, %v1102_v35  ;;  %v676_v17 = vand.u32 2147483647, %v1102_v35 }
 0x34b   :  { %1109 = vpow2.f32 %v630_v28 }
 0x34c   :  { %v1586_v43 = vpop.eup %1103  ;;  %1111 = vlog2.f32 %v670_v25  ;;  %v632_v44 = vmul.f32 1.442695, %v1582_v34  ;;  %v674_v26 = vadd.f32 1.0, %v673_v19  ;;  %vm1624_vm11 = vcmp.lt.f32.partialorder %v676_v17, 0.0004427343 }
 0x34d   :  { %v679_v41 = vadd.f32 1.0, %v1586_v43  ;;  %v1590_v15 = vpop.eup %1105  ;;  %1113 = vlog2.f32 %v652_v60  ;;  %v682_v38 = vmul.f32 -0.5, %v1586_v43  ;;  %v685_v46 = vand.u32 2147483647, %v1586_v43  ;;  %v804_v60 = vpop.permute.xlu2 %803 }
 0x34e   :  { %v1108_v31 = vpop.eup %1107  ;;  %1115 = vlog2.f32 %v643_v49  ;;  %v661_v50 = vadd.f32 1.0, %v1590_v15  ;;  %v664_v2 = vmul.f32 -0.5, %v1590_v15  ;;  %v675_v13 = vmul.f32 %v1102_v35, %v674_v26 }
 0x34f   :  { %1117 = vpow2.f32 %v632_v44  ;;  %v1601_v3 = vmul.f32 0.6931472, %v1108_v31  ;;  %v683_v39 = vadd.f32 1.0, %v682_v38  ;;  %v1189_v19 = vmov 65535  }
 0x350   :  { %1119 = vlog2.f32 %v679_v41  ;;  %v740_v29 = vsel %vm42_vm0, 4294967295, %v1189_v19  ;;  %vm1642_vm13 = vcmp.lt.f32.partialorder %v685_v46, 0.0004427343  ;;  %v667_v7 = vand.u32 2147483647, %v1590_v15  ;;  %v799_v46 = vpop.permute.xlu1 %798 }
 0x351   :  { %v1110_v37 = vpop.eup %1109  ;;  %v642_v61 = vsel %vm1608_vm8, %v1606_v11, %v1601_v3  ;;  %v684_v18 = vmul.f32 %v1586_v43, %v683_v39  ;;  %v741_v43 = vsel %vm739_vm12, %v740_v29, 0  ;;  %vm617_vm6 = vcmp.gt.f32.partialorder %v1582_v34, 20.0  ;;  %v336_v34 = vpop.f32.mrf.mxu0 }
 0x352   :  { %v1112_v6 = vpop.eup %1111  ;;  %v688_v8 = vadd.f32 1.0, %v1110_v37  ;;  %v691_v54 = vmul.f32 -0.5, %v1110_v37  ;;  %v694_v49 = vand.u32 2147483647, %v1110_v37  ;;  %vm1656_vm1 = vcmp.lt.f32.partialorder %v667_v7, 0.0004427343  ;;  %v789_v29 = vpop.permute.xlu0 %788 }
 0x353   :  { %v1114_v36 = vpop.eup %1113  ;;  %v672_v27 = vmul.f32 0.6931472, %v1112_v6  ;;  %v665_v6 = vadd.f32 1.0, %v664_v2  ;;  %v706_v39 = vmul.f32 0.01, %v642_v61  ;;  %vm610_vm8 = vcmp.gt.f32.partialorder %v1536_v30, 20.0 }
 0x354   :  { %1121 = vlog2.f32 %v688_v8  ;;  %v1116_v57 = vpop.eup %1115  ;;  %v692_v22 = vadd.f32 1.0, %v691_v54  ;;  %v654_v25 = vmul.f32 0.6931472, %v1114_v36  ;;  %v292_v8 = vld [vmem:[%s1812_s1 + $0x58] sm:$0xff]  ;;  %vm695_vm0 = vcmp.lt.f32.partialorder %v694_v49, 0.0004427343 }
 0x355   :  { %1123 = vlog2.f32 %v661_v50  ;;  %v1118_v21 = vpop.eup %1117  ;;  %v678_v44 = vsel %vm1624_vm11, %v675_v13, %v672_v27  ;;  %v645_v45 = vmul.f32 0.6931472, %v1116_v57  ;;  %v297_v57 = vpack.c.bf16 %v293_v14, %v292_v8 }
 0x356   :  { %v1120_v16 = vpop.eup %1119  ;;  %v697_v28 = vadd.f32 1.0, %v1118_v21  ;;  %v700_v41 = vmul.f32 -0.5, %v1118_v21  ;;  %v693_v32 = vmul.f32 %v1110_v37, %v692_v22  ;;  %v660_v50 = vsel %vm1618_vm9, %v657_v48, %v654_v25 }
 0x357   :  { %v681_v35 = vmul.f32 0.6931472, %v1120_v16  ;;  %v710_v3 = vmul.f32 0.01, %v678_v44  ;;  %v703_v11 = vand.u32 2147483647, %v1118_v21  ;;  %v666_v5 = vmul.f32 %v1590_v15, %v665_v6  ;;  %1010 = vmatmul.msk.bf16.gmra.mxu0 %vm298_vm4, %v297_v57  ;;  %1014 = vmatmul.msk.bf16.gmra.mxu1 %vm298_vm4, %v297_v57 }
 0x358   :  { %1125 = vlog2.f32 %v697_v28  ;;  %v701_v26 = vadd.f32 1.0, %v700_v41  ;;  %v708_v63 = vmul.f32 0.01, %v660_v50  ;;  %v648_v49 = vmul.f32 %v1576_v24, %v647_v23 }
 0x359   :  { %v687_v36 = vsel %vm1642_vm13, %v684_v18, %v681_v35  ;;  %v718_v2 = vsel %vm614_vm10, %v1552_v58, %v710_v3  ;;  %vm704_vm15 = vcmp.lt.f32.partialorder %v703_v11, 0.0004427343  ;;  %v714_v44 = vsel %vm610_vm8, %v1533_v12, %v706_v39 }
 0x35a   :  { %v1122_v31 = vpop.eup %1121  ;;  %v702_v22 = vmul.f32 %v1118_v21, %v701_v26  ;;  %v711_v28 = vmul.f32 0.01, %v687_v36  ;;  %v651_v23 = vsel %vm650_vm3, %v648_v49, %v645_v45  ;;  %vm613_vm4 = vcmp.gt.f32.partialorder %v1559_v0, 20.0 }
 0x35b   :  { %v1124_v9 = vpop.eup %1123  ;;  %v690_v40 = vmul.f32 0.6931472, %v1122_v31  ;;  %v707_v56 = vmul.f32 0.01, %v651_v23  ;;  %vm732_vm9 = vcmask 203776   ;;  %vm611_vm10 = vcmp.gt.f32.partialorder %v1547_v55, 20.0  ;;  %v338_v55 = vpop.f32.mrf.mxu0 }
 0x35c   :  { %v663_v38 = vmul.f32 0.6931472, %v1124_v9  ;;  %v719_v21 = vsel %vm615_vm5, %v1561_v1, %v711_v28 }
 0x35d   :  { %v696_v37 = vsel %vm695_vm0, %v693_v32, %v690_v40  ;;  %v715_v12 = vsel %vm611_vm10, %v1540_v52, %v707_v56  ;;  %v794_v40 = vpop.permute.xlu1 %793 }
 0x35e   :  { %v712_v17 = vmul.f32 0.01, %v696_v37  ;;  %v1126_v27 = vpop.eup %1125  ;;  %v669_v15 = vsel %vm1656_vm1, %v666_v5, %v663_v38 }
 0x35f   :  { %v699_v13 = vmul.f32 0.6931472, %v1126_v27  ;;  %v709_v53 = vmul.f32 0.01, %v669_v15 }
 0x360   :  { %v720_v16 = vsel %vm616_vm14, %v1569_v10, %v712_v17  ;;  %v716_v10 = vsel %vm612_vm2, %v1538_v51, %v708_v63  ;;  %v726_v51 = vpack.c.bf16 %v1307_v62, %v1159_v4  ;;  %v1160_v62 = vld [vmem:[%s1812_s1 + $0x98] sm:$0xff] }
 0x361   :  { %v730_v25 = vpack.c.bf16 %v720_v16, %v718_v2  ;;  %v705_v20 = vsel %vm704_vm15, %v702_v22, %v699_v13  ;;  %v728_v24 = vpack.c.bf16 %v716_v10, %v714_v44  ;;  %v717_v1 = vsel %vm613_vm4, %v1549_v42, %v709_v53  ;;  %v365_v42 = vpop.f32.mrf.mxu1 }
 0x362   :  { %v713_v58 = vmul.f32 0.01, %v705_v20  ;;  %v727_v0 = vpack.c.bf16 %v1383_v47, %v1160_v62 }
 0x363   :  { %v743_v59 = vand.u32 %v741_v43, %v730_v25 }
 0x364   :  { %v721_v61 = vsel %vm617_vm6, %v1578_v33, %v713_v58  ;;  %v729_v33 = vpack.c.bf16 %v717_v1, %v715_v12 }
 0x365   :  { %754 = vmatpush.bf16.msrb.mxu2 %v743_v59  ;;  %v731_v41 = vpack.c.bf16 %v721_v61, %v719_v21 }
 0x367   :  { %v746_v30 = vand.u32 %v741_v43, %v731_v41 }
 0x369   :  { %755 = vmatpush.bf16.msrb.mxu2 %v728_v24  ;;  %773 = vmatpush.bf16.msrb.mxu3 %v746_v30  ;;  %v367_v45 = vpop.f32.mrf.mxu1 }
 0x36c   :  { %1019 = vmatmul.msk.bf16.vlgmr.msrb.gmra.mxu2 %vm732_vm9, %v726_v51 }
 0x36d   :  { %774 = vmatpush.bf16.msrb.mxu3 %v729_v33 }
 0x370   :  { %1021 = vmatmul.msk.bf16.vlgmr.msrb.gmra.mxu3 %vm732_vm9, %v726_v51 }
 0x37c   :  { %1020 = vmatmul.msk.bf16.gmra.mxu2 %vm732_vm9, %v727_v0 }
 0x380   :  { %1022 = vmatmul.msk.bf16.gmra.mxu3 %vm732_vm9, %v727_v0 }
 0x3d4   :  { %v341_v14 = vpop.f32.mrf.mxu0  ;;  %v370_v36 = vpop.f32.mrf.mxu1 }
 0x3dc   :  { %v343_v13 = vpop.f32.mrf.mxu0  ;;  %v372_v59 = vpop.f32.mrf.mxu1 }
 0x3ef   :  { %v757_v48 = vpop.f32.mrf.mxu2 }
 0x3f0   :  { %v758_v35 = vadd.f32 %v757_v48, %v336_v34 }
 0x3f2   :  { %v1687_v32 = vadd.f32 %v789_v29, %v758_v35 }
 0x3f3   :  { %v776_v31 = vpop.f32.mrf.mxu3 }
 0x3f4   :  { %v777_v52 = vadd.f32 %v776_v31, %v365_v42  ;;  %v1694_v8 = vmul.f32 100.0, %v1687_v32 }
 0x3f6   :  { %v1691_v47 = vadd.f32 %v789_v29, %v777_v52  ;;  %v830_v7 = vmul.f32 1.442695, %v1694_v8  ;;  %vm822_vm8 = vcmp.gt.f32.partialorder %v1694_v8, 20.0 }
 0x3f7   :  { %v759_v19 = vpop.f32.mrf.mxu2 }
 0x3f8   :  { %v760_v9 = vadd.f32 %v759_v19, %v338_v55  ;;  %v1700_v26 = vmul.f32 100.0, %v1691_v47  ;;  %1127 = vpow2.f32 %v830_v7 }
 0x3fa   :  { %v1689_v50 = vadd.f32 %v794_v40, %v760_v9  ;;  %v832_v27 = vmul.f32 1.442695, %v1700_v26 }
 0x3fb   :  { %v778_v6 = vpop.f32.mrf.mxu3 }
 0x3fc   :  { %v779_v3 = vadd.f32 %v778_v6, %v367_v45  ;;  %v1697_v18 = vmul.f32 100.0, %v1689_v50 }
 0x3fe   :  { %v1702_v54 = vadd.f32 %v794_v40, %v779_v3  ;;  %v834_v17 = vmul.f32 1.442695, %v1697_v18  ;;  %v1128_v49 = vpop.eup %1127  ;;  %vm824_vm14 = vcmp.gt.f32.partialorder %v1697_v18, 20.0 }
 0x3ff   :  { %v762_v37 = vpop.f32.mrf.mxu2  ;;  %v846_v44 = vadd.f32 1.0, %v1128_v49  ;;  %v849_v12 = vmul.f32 -0.5, %v1128_v49  ;;  %v852_v48 = vand.u32 2147483647, %v1128_v49 }
 0x400   :  { %v763_v11 = vadd.f32 %v762_v37, %v341_v14  ;;  %v1707_v38 = vmul.f32 100.0, %v1702_v54  ;;  %1129 = vpow2.f32 %v834_v17 }
 0x401   :  { %1131 = vpow2.f32 %v832_v27  ;;  %v850_v31 = vadd.f32 1.0, %v849_v12  ;;  %vm1746_vm11 = vcmp.lt.f32.partialorder %v852_v48, 0.0004427343 }
 0x402   :  { %v1709_v57 = vadd.f32 %v799_v46, %v763_v11  ;;  %v836_v2 = vmul.f32 1.442695, %v1707_v38  ;;  %vm825_vm10 = vcmp.gt.f32.partialorder %v1707_v38, 20.0 }
 0x403   :  { %v781_v63 = vpop.f32.mrf.mxu3  ;;  %v851_v17 = vmul.f32 %v1128_v49, %v850_v31 }
 0x404   :  { %v1713_v43 = vmul.f32 100.0, %v1709_v57  ;;  %v782_v5 = vadd.f32 %v781_v63, %v370_v36 }
 0x406   :  { %v838_v16 = vmul.f32 1.442695, %v1713_v43  ;;  %v1717_v22 = vadd.f32 %v799_v46, %v782_v5  ;;  %v1130_v58 = vpop.eup %1129  ;;  %vm826_vm0 = vcmp.gt.f32.partialorder %v1713_v43, 20.0 }
 0x407   :  { %v764_v28 = vpop.f32.mrf.mxu2  ;;  %v1728_v21 = vpop.eup %1131  ;;  %v864_v4 = vadd.f32 1.0, %v1130_v58  ;;  %v867_v0 = vmul.f32 -0.5, %v1130_v58  ;;  %v870_v45 = vand.u32 2147483647, %v1130_v58 }
 0x408   :  { %1133 = vpow2.f32 %v838_v16  ;;  %v765_v25 = vadd.f32 %v764_v28, %v343_v13  ;;  %v1720_v20 = vmul.f32 100.0, %v1717_v22  ;;  %v855_v30 = vadd.f32 1.0, %v1728_v21 }
 0x409   :  { %1135 = vpow2.f32 %v836_v2  ;;  %v858_v35 = vmul.f32 -0.5, %v1728_v21  ;;  %v868_v29 = vadd.f32 1.0, %v867_v0  ;;  %v861_v27 = vand.u32 2147483647, %v1728_v21 }
 0x40a   :  { %v1722_v39 = vadd.f32 %v804_v60, %v765_v25  ;;  %v840_v15 = vmul.f32 1.442695, %v1720_v20  ;;  %vm1752_vm12 = vcmp.lt.f32.partialorder %v870_v45, 0.0004427343  ;;  %vm827_vm4 = vcmp.gt.f32.partialorder %v1720_v20, 20.0 }
 0x40b   :  { %v783_v23 = vpop.f32.mrf.mxu3  ;;  %v869_v16 = vmul.f32 %v1130_v58, %v868_v29  ;;  %v859_v28 = vadd.f32 1.0, %v858_v35  ;;  %vm862_vm6 = vcmp.lt.f32.partialorder %v861_v27, 0.0004427343 }
 0x40c   :  { %v1726_v10 = vmul.f32 100.0, %v1722_v39  ;;  %1137 = vpow2.f32 %v840_v15  ;;  %v784_v61 = vadd.f32 %v783_v23, %v372_v59 }
 0x40d   :  { %v860_v11 = vmul.f32 %v1728_v21, %v859_v28 }
 0x40e   :  { %v1134_v53 = vpop.eup %1133  ;;  %v842_v41 = vmul.f32 1.442695, %v1726_v10  ;;  %v1731_v56 = vadd.f32 %v804_v60, %v784_v61  ;;  %vm828_vm3 = vcmp.gt.f32.partialorder %v1726_v10, 20.0 }
 0x40f   :  { %v882_v24 = vadd.f32 1.0, %v1134_v53  ;;  %v1733_v51 = vpop.eup %1135  ;;  %v885_v42 = vmul.f32 -0.5, %v1134_v53  ;;  %v888_v3 = vand.u32 2147483647, %v1134_v53 }
 0x410   :  { %1139 = vpow2.f32 %v842_v41  ;;  %v1737_v1 = vmul.f32 100.0, %v1731_v56  ;;  %v873_v34 = vadd.f32 1.0, %v1733_v51  ;;  %v876_v63 = vmul.f32 -0.5, %v1733_v51 }
 0x411   :  { %1141 = vlog2.f32 %v882_v24  ;;  %v886_v40 = vadd.f32 1.0, %v885_v42  ;;  %vm1757_vm13 = vcmp.lt.f32.partialorder %v888_v3, 0.0004427343 }
 0x412   :  { %1143 = vlog2.f32 %v846_v44  ;;  %v1739_v33 = vpop.eup %1137  ;;  %v844_v62 = vmul.f32 1.442695, %v1737_v1  ;;  %vm829_vm9 = vcmp.gt.f32.partialorder %v1737_v1, 20.0  ;;  %v980_v1 = vlaneseq }
 0x413   :  { %1145 = vlog2.f32 %v864_v4  ;;  %v891_v46 = vadd.f32 1.0, %v1739_v33  ;;  %v894_v37 = vmul.f32 -0.5, %v1739_v33  ;;  %v887_v60 = vmul.f32 %v1134_v53, %v886_v40 }
 0x414   :  { %1147 = vlog2.f32 %v855_v30  ;;  %v897_v4 = vand.u32 2147483647, %v1739_v33  ;;  %v877_v53 = vadd.f32 1.0, %v876_v63 }
 0x415   :  { %1149 = vpow2.f32 %v844_v62  ;;  %v895_v41 = vadd.f32 1.0, %v894_v37 }
 0x416   :  { %v1140_v55 = vpop.eup %1139  ;;  %1151 = vlog2.f32 %v891_v46  ;;  %vm1771_vm1 = vcmp.lt.f32.partialorder %v897_v4, 0.0004427343  ;;  %v878_v40 = vmul.f32 %v1733_v51, %v877_v53 }
 0x417   :  { %v1142_v52 = vpop.eup %1141  ;;  %v900_v19 = vadd.f32 1.0, %v1140_v55  ;;  %1153 = vlog2.f32 %v873_v34  ;;  %v903_v6 = vmul.f32 -0.5, %v1140_v55  ;;  %v906_v44 = vand.u32 2147483647, %v1140_v55 }
 0x418   :  { %v1144_v9 = vpop.eup %1143  ;;  %v884_v36 = vmul.f32 0.6931472, %v1142_v52  ;;  %v879_v34 = vand.u32 2147483647, %v1733_v51  ;;  %v896_v52 = vmul.f32 %v1739_v33, %v895_v41 }
 0x419   :  { %v1146_v14 = vpop.eup %1145  ;;  %1155 = vlog2.f32 %v900_v19  ;;  %v848_v2 = vmul.f32 0.6931472, %v1144_v9  ;;  %v904_v15 = vadd.f32 1.0, %v903_v6  ;;  %vm907_vm15 = vcmp.lt.f32.partialorder %v906_v44, 0.0004427343 }
 0x41a   :  { %v1148_v7 = vpop.eup %1147  ;;  %v866_v23 = vmul.f32 0.6931472, %v1146_v14  ;;  %v890_v24 = vsel %vm1757_vm13, %v887_v60, %v884_v36  ;;  %vm1778_vm2 = vcmp.lt.f32.partialorder %v879_v34, 0.0004427343  ;;  %v943_v60 = vpop.permute.xlu2 %942 }
 0x41b   :  { %v1150_v5 = vpop.eup %1149  ;;  %v854_v62 = vsel %vm1746_vm11, %v851_v17, %v848_v2  ;;  %v857_v0 = vmul.f32 0.6931472, %v1148_v7  ;;  %v905_v46 = vmul.f32 %v1140_v55, %v904_v15  ;;  %v922_v35 = vmul.f32 0.01, %v890_v24 }
 0x41c   :  { %v1152_v25 = vpop.eup %1151  ;;  %v909_v59 = vadd.f32 1.0, %v1150_v5  ;;  %v912_v58 = vmul.f32 -0.5, %v1150_v5  ;;  %v872_v48 = vsel %vm1752_vm12, %v869_v16, %v866_v23  ;;  %v915_v9 = vand.u32 2147483647, %v1150_v5 }
 0x41d   :  { %v1154_v49 = vpop.eup %1153  ;;  %v893_v12 = vmul.f32 0.6931472, %v1152_v25  ;;  %v920_v14 = vmul.f32 0.01, %v872_v48  ;;  %v918_v37 = vmul.f32 0.01, %v854_v62  ;;  %v930_v51 = vsel %vm826_vm0, %v1709_v57, %v922_v35 }
 0x41e   :  { %1157 = vlog2.f32 %v909_v59  ;;  %v875_v31 = vmul.f32 0.6931472, %v1154_v49  ;;  %v913_v19 = vadd.f32 1.0, %v912_v58  ;;  %vm916_vm5 = vcmp.lt.f32.partialorder %v915_v9, 0.0004427343 }
 0x41f   :  { %v1156_v30 = vpop.eup %1155  ;;  %v899_v55 = vsel %vm1771_vm1, %v896_v52, %v893_v12  ;;  %v928_v10 = vsel %vm824_vm14, %v1689_v50, %v920_v14  ;;  %v863_v21 = vsel %vm862_vm6, %v860_v11, %v857_v0  ;;  %v926_v57 = vsel %vm822_vm8, %v1687_v32, %v918_v37  ;;  %v1161_v50 = vld [vmem:[%s1812_s1 + $0xa8] sm:$0x1]  ;;  %s1190_s1 = smov [#allocation2]  }
 0x420   :  { %v902_v42 = vmul.f32 0.6931472, %v1156_v30  ;;  %v881_v7 = vsel %vm1778_vm2, %v878_v40, %v875_v31  ;;  %v914_v63 = vmul.f32 %v1150_v5, %v913_v19  ;;  %v923_v2 = vmul.f32 0.01, %v899_v55  ;;  %s990_s18 = sshll.u32 %s1190_s1, 4  ;;  %s991_s18 = int_to_ptr.vmem [resolvable:$true] %s990_s18 }
 0x421   :  { %v921_v43 = vmul.f32 0.01, %v881_v7  ;;  %v936_v5 = vpack.c.bf16 %v928_v10, %v926_v57  ;;  %v919_v25 = vmul.f32 0.01, %v863_v21  ;;  %v935_v8 = vpack.c.bf16 %v1161_v50, %v1161_v50 }
 0x422   :  { %v908_v45 = vsel %vm907_vm15, %v905_v46, %v902_v42  ;;  %vm823_vm11 = vcmp.gt.f32.partialorder %v1700_v26, 20.0  ;;  %vm977_vm12 = vcmask 1040384   ;;  %vm982_vm0 = vcmp.lt.s32.totalorder %v980_v1, 256 }
 0x423   :  { %v924_v6 = vmul.f32 0.01, %v908_v45  ;;  %v929_v20 = vsel %vm825_vm10, %v1702_v54, %v921_v43  ;;  %v927_v32 = vsel %vm823_vm11, %v1691_v47, %v919_v25 }
 0x424   :  { %v1158_v33 = vpop.eup %1157 }
 0x425   :  { %v932_v36 = vsel %vm828_vm3, %v1722_v39, %v924_v6  ;;  %v911_v17 = vmul.f32 0.6931472, %v1158_v33  ;;  %v931_v39 = vsel %vm827_vm4, %v1717_v22, %v923_v2  ;;  %v937_v22 = vpack.c.bf16 %v929_v20, %v927_v32 }
 0x426   :  { %v938_v16 = vpack.c.bf16 %v932_v36, %v930_v51 }
 0x427   :  { %v917_v13 = vsel %vm916_vm5, %v914_v63, %v911_v17 }
 0x428   :  { %v925_v28 = vmul.f32 0.01, %v917_v13  ;;  %954 = vmatpush.bf16.msra.mxu0 %v938_v16 }
 0x42a   :  { %v933_v27 = vsel %vm829_vm9, %v1731_v56, %v925_v28 }
 0x42b   :  { %v939_v18 = vpack.c.bf16 %v933_v27, %v931_v39 }
 0x42c   :  { %955 = vmatpush.bf16.msra.mxu0 %v936_v5 }
 0x42d   :  { %967 = vmatpush.bf16.msra.mxu1 %v939_v18 }
 0x42f   :  { %1023 = vmatmul.msk.bf16.vlgmr.msra.gmra.mxu0 %vm557_vm7, %v935_v8 }
 0x431   :  { %968 = vmatpush.bf16.msra.mxu1 %v937_v22 }
 0x434   :  { %1024 = vmatmul.msk.bf16.vlgmr.msra.gmra.mxu1 %vm557_vm7, %v935_v8 }
 0x4ac   :  { %v957_v56 = vpop.f32.mrf.mxu0 }
 0x4ad   :  { %v958_v26 = vadd.f32 %v957_v56, %v943_v60 }
 0x4b1   :  { %v970_v15 = vpop.f32.mrf.mxu1 }
 0x4b2   :  { %v971_v38 = vadd.f32 %v970_v15, %v943_v60 }
 0x4b4   :  { %v976_v47 = vrot.slane %v971_v38, 7  ;;  %v959_v54 = vpop.f32.mrf.mxu0 }
 0x4b6   :  { %v978_v59 = vsel %vm977_vm12, %v958_v26, %v976_v47 }
 0x4b7   :  { %984 = vst.msk [vmem:[#allocation2] sm:$0x3] %vm982_vm0, %v978_v59 }
 0x4b8   :  { %995 = dma.vmem_to_hbm [thread:$0]  %s991_s18, 32, %s993_s21, [#allocation3]  }
 0x4b9   :  { %v972_v23 = vpop.f32.mrf.mxu1 }
 0x4ba   :  { %1186 = dma.done.wait [#allocation3], 32  }
 0x4bb   :  { %1187 = vsyncadd [#allocation3], 4294967264 }
 0x4bc   :  { %1000 = vsyncpa [#allocation3], 1 }

</bundles_post_ra>
